<compile_context>
chip_gen: v7x
topology: tpu7x:2x2x1
jax: 0.10.0
libtpu: 0.0.40
codegen_flags: <defaults>
</compile_context>

<pallas_src>
import jax
import jax.numpy as jnp
from jax import lax
from jax.experimental import pallas as pl
from jax.experimental.pallas import tpu as pltpu


def _round_up(a, b):
    return ((a + b - 1) // b) * b


def mlp_kernel(x_ref, w1_ref, b1_ref, w2_ref, b2_ref, w3_ref, b3_ref, o_ref):
    # x_ref : VMEM block (8, block_rows, 128)  -- batch on (sublane, lane)
    # w*_ref: SMEM, PyTorch layout (out_features, in_features)
    # b*_ref: SMEM, (out_features,)
    # o_ref : VMEM block (block_rows, 128)     -- lane-dense output

    # Hoist all SMEM scalar reads (76 weights + 11 biases) out of the strip
    # loop: JAX does not CSE the re-reads / re-splats.
    w1 = [[w1_ref[j, k] for k in range(8)] for j in range(6)]
    b1 = [b1_ref[j] for j in range(6)]
    w2 = [[w2_ref[j, k] for k in range(6)] for j in range(4)]
    b2 = [b2_ref[j] for j in range(4)]
    w3 = [[w3_ref[0, k] for k in range(4)]]
    b3 = [b3_ref[0]]

    def dense(inputs, w, b, act):
        # inputs: list of (8, 128) f32 vregs, one per input feature.
        outs = []
        for j in range(len(b)):
            acc = inputs[0] * w[j][0]          # scalar-broadcast FMA chain (VPU)
            for k in range(1, len(inputs)):
                acc = acc + inputs[k] * w[j][k]
            outs.append(act(acc + b[j]))
        return outs

    relu = lambda v: jnp.maximum(v, 0.0)

    def sigmoid(v):
        # Stable logistic: exp(-|v|) never overflows; exp -> EUP, one divide
        # per strip for the single layer-3 output is negligible.
        z = jnp.exp(-jnp.abs(v))
        r = 1.0 / (1.0 + z)
        return jnp.where(v >= 0, r, z * r)

    n_strips = o_ref.shape[0] // 8             # block_rows is a multiple of 8

    def strip(s, carry):
        row = pl.multiple_of(s * 8, 8)
        xs = [x_ref[k, pl.ds(row, 8), :] for k in range(8)]   # 8 x (8,128) vregs
        h1 = dense(xs, w1, b1, relu)                          # 6 x (8,128)
        h2 = dense(h1, w2, b2, relu)                          # 4 x (8,128)
        (y,) = dense(h2, w3, b3, sigmoid)                     # 1 x (8,128)
        o_ref[pl.ds(row, 8), :] = y
        return carry

    lax.fori_loop(0, n_strips, strip, 0)


def mlp_forward(x, w1, b1, w2, b2, w3, b3, *, block_rows=None):
    """x: (N, 8) f32 -> (N, 1) f32."""
    n, in_f = x.shape
    assert in_f == 8
    lanes = 128
    granule = 8 * lanes                        # one (8,128) f32 vreg of batch

    # Pad only to a vreg granule (<= 1023 wasted elements), NOT to a full
    # grid tile; the ragged last grid block is read-padded / store-masked.
    n_pad = _round_up(n, granule)
    rows_total = n_pad // lanes                # multiple of 8

    if block_rows is None:
        # Target ~8 grid steps (lets the "parallel" batch axis shard across
        # both TensorCores on v7x), capped at 512 rows (2 MiB f32 per x buffer
        # -> double-buffered x + out well under scoped-VMEM defaults on
        # v5e/v6e/v7x).  Tune up to 1024 on v6e for very large N.
        block_rows = min(512, max(8, _round_up(pl.cdiv(rows_total, 8), 8)))
    block_rows = max(8, min(_round_up(block_rows, 8), rows_total))
    grid = (pl.cdiv(rows_total, block_rows),)

    # Layout plumbing (one XLA copy): batch-on-lanes (8, rows_total, 128).
    xt = jnp.transpose(x, (1, 0))              # (8, N)
    if n_pad != n:
        xt = jnp.pad(xt, ((0, 0), (0, n_pad - n)))
    x3 = xt.reshape(8, rows_total, lanes)

    smem = lambda: pl.BlockSpec(memory_space=pltpu.MemorySpace.SMEM)
    out = pl.pallas_call(
        mlp_kernel,
        out_shape=jax.ShapeDtypeStruct((rows_total, lanes), jnp.float32),
        grid=grid,
        in_specs=[
            pl.BlockSpec((8, block_rows, lanes), lambda i: (0, i, 0)),
            smem(), smem(),                    # w1, b1 (resident in SMEM)
            smem(), smem(),                    # w2, b2
            smem(), smem(),                    # w3, b3
        ],
        out_specs=pl.BlockSpec((block_rows, lanes), lambda i: (i, 0)),
        compiler_params=pltpu.CompilerParams(
            dimension_semantics=("parallel",),  # v7x: shard batch over 2 TCs
        ),
    )(x3, w1, b1, w2, b2, w3, b3)

    # (rows, 128) -> (N, 1); row r, lane l is batch element r*128 + l.
    return out.reshape(n_pad, 1)[:n]


def init_params(key):
    """PyTorch-default-like init. Weights kept in PyTorch layout (out, in)."""
    def linear(key, fan_in, fan_out):
        kw, kb = jax.random.split(key)
        bound = 1.0 / jnp.sqrt(fan_in)
        w = jax.random.uniform(kw, (fan_out, fan_in), jnp.float32, -bound, bound)
        b = jax.random.uniform(kb, (fan_out,), jnp.float32, -bound, bound)
        return w, b

    k1, k2, k3 = jax.random.split(key, 3)
    w1, b1 = linear(k1, 8, 6)
    w2, b2 = linear(k2, 6, 4)
    w3, b3 = linear(k3, 4, 1)
    return w1, b1, w2, b2, w3, b3


def reference_forward(x, w1, b1, w2, b2, w3, b3):
    dot = lambda a, b: jnp.dot(a, b, precision=jax.lax.Precision.HIGHEST)
    h1 = jnp.maximum(dot(x, w1.T) + b1, 0.0)
    h2 = jnp.maximum(dot(h1, w2.T) + b2, 0.0)
    return jax.nn.sigmoid(dot(h2, w3.T) + b3)


if __name__ == "__main__":
    key = jax.random.PRNGKey(0)
    kx, kp = jax.random.split(key)

    batch = 2000                     # not a multiple of 128*8: exercises padding
    x = jax.random.normal(kx, (batch, 8), jnp.float32)
    params = init_params(kp)

    out = mlp_forward(x, *params)    # auto block_rows -> 2 ragged-free grid steps
    out = jax.block_until_ready(out)

    ref = reference_forward(x, *params)
    assert out.shape == (batch, 1), out.shape
    assert jnp.allclose(out, ref, atol=1e-5, rtol=1e-5), "mismatch vs reference"

    print("KERNEL_OK")
</pallas_src>

<mosaic_0001>
module attributes {stable_mosaic.version = 11 : i64} {
  func.func @mlp_kernel(%arg0: i32, %arg1: memref<8x8x128xf32, #tpu.memory_space<vmem>>, %arg2: memref<6x8xf32, #tpu.memory_space<smem>>, %arg3: memref<6xf32, #tpu.memory_space<smem>>, %arg4: memref<4x6xf32, #tpu.memory_space<smem>>, %arg5: memref<4xf32, #tpu.memory_space<smem>>, %arg6: memref<1x4xf32, #tpu.memory_space<smem>>, %arg7: memref<1xf32, #tpu.memory_space<smem>>, %arg8: memref<8x128xf32, #tpu.memory_space<vmem>>) attributes {dimension_semantics = [#tpu.dimension_semantics<parallel>], iteration_bounds = array<i64: 2>, scalar_prefetch = 0 : i64, scratch_operands = 0 : i64, tpu.core_type = #tpu.core_type<tc>, window_params = [{transform_indices = @transform_0, window_bounds = array<i64: 8, 8, 128>}, {transform_indices = @transform_1, window_bounds = array<i64: 6, 8>}, {transform_indices = @transform_2, window_bounds = array<i64: 6>}, {transform_indices = @transform_3, window_bounds = array<i64: 4, 6>}, {transform_indices = @transform_4, window_bounds = array<i64: 4>}, {transform_indices = @transform_5, window_bounds = array<i64: 1, 4>}, {transform_indices = @transform_6, window_bounds = array<i64: 1>}, {transform_indices = @transform_7, window_bounds = array<i64: 8, 128>}]} {
    %c0 = arith.constant 0 : index
    %c0_0 = arith.constant 0 : index
    %0 = memref.load %arg2[%c0, %c0_0] : memref<6x8xf32, #tpu.memory_space<smem>>
    %c0_1 = arith.constant 0 : index
    %c1 = arith.constant 1 : index
    %1 = memref.load %arg2[%c0_1, %c1] : memref<6x8xf32, #tpu.memory_space<smem>>
    %c0_2 = arith.constant 0 : index
    %c2 = arith.constant 2 : index
    %2 = memref.load %arg2[%c0_2, %c2] : memref<6x8xf32, #tpu.memory_space<smem>>
    %c0_3 = arith.constant 0 : index
    %c3 = arith.constant 3 : index
    %3 = memref.load %arg2[%c0_3, %c3] : memref<6x8xf32, #tpu.memory_space<smem>>
    %c0_4 = arith.constant 0 : index
    %c4 = arith.constant 4 : index
    %4 = memref.load %arg2[%c0_4, %c4] : memref<6x8xf32, #tpu.memory_space<smem>>
    %c0_5 = arith.constant 0 : index
    %c5 = arith.constant 5 : index
    %5 = memref.load %arg2[%c0_5, %c5] : memref<6x8xf32, #tpu.memory_space<smem>>
    %c0_6 = arith.constant 0 : index
    %c6 = arith.constant 6 : index
    %6 = memref.load %arg2[%c0_6, %c6] : memref<6x8xf32, #tpu.memory_space<smem>>
    %c0_7 = arith.constant 0 : index
    %c7 = arith.constant 7 : index
    %7 = memref.load %arg2[%c0_7, %c7] : memref<6x8xf32, #tpu.memory_space<smem>>
    %c1_8 = arith.constant 1 : index
    %c0_9 = arith.constant 0 : index
    %8 = memref.load %arg2[%c1_8, %c0_9] : memref<6x8xf32, #tpu.memory_space<smem>>
    %c1_10 = arith.constant 1 : index
    %c1_11 = arith.constant 1 : index
    %9 = memref.load %arg2[%c1_10, %c1_11] : memref<6x8xf32, #tpu.memory_space<smem>>
    %c1_12 = arith.constant 1 : index
    %c2_13 = arith.constant 2 : index
    %10 = memref.load %arg2[%c1_12, %c2_13] : memref<6x8xf32, #tpu.memory_space<smem>>
    %c1_14 = arith.constant 1 : index
    %c3_15 = arith.constant 3 : index
    %11 = memref.load %arg2[%c1_14, %c3_15] : memref<6x8xf32, #tpu.memory_space<smem>>
    %c1_16 = arith.constant 1 : index
    %c4_17 = arith.constant 4 : index
    %12 = memref.load %arg2[%c1_16, %c4_17] : memref<6x8xf32, #tpu.memory_space<smem>>
    %c1_18 = arith.constant 1 : index
    %c5_19 = arith.constant 5 : index
    %13 = memref.load %arg2[%c1_18, %c5_19] : memref<6x8xf32, #tpu.memory_space<smem>>
    %c1_20 = arith.constant 1 : index
    %c6_21 = arith.constant 6 : index
    %14 = memref.load %arg2[%c1_20, %c6_21] : memref<6x8xf32, #tpu.memory_space<smem>>
    %c1_22 = arith.constant 1 : index
    %c7_23 = arith.constant 7 : index
    %15 = memref.load %arg2[%c1_22, %c7_23] : memref<6x8xf32, #tpu.memory_space<smem>>
    %c2_24 = arith.constant 2 : index
    %c0_25 = arith.constant 0 : index
    %16 = memref.load %arg2[%c2_24, %c0_25] : memref<6x8xf32, #tpu.memory_space<smem>>
    %c2_26 = arith.constant 2 : index
    %c1_27 = arith.constant 1 : index
    %17 = memref.load %arg2[%c2_26, %c1_27] : memref<6x8xf32, #tpu.memory_space<smem>>
    %c2_28 = arith.constant 2 : index
    %c2_29 = arith.constant 2 : index
    %18 = memref.load %arg2[%c2_28, %c2_29] : memref<6x8xf32, #tpu.memory_space<smem>>
    %c2_30 = arith.constant 2 : index
    %c3_31 = arith.constant 3 : index
    %19 = memref.load %arg2[%c2_30, %c3_31] : memref<6x8xf32, #tpu.memory_space<smem>>
    %c2_32 = arith.constant 2 : index
    %c4_33 = arith.constant 4 : index
    %20 = memref.load %arg2[%c2_32, %c4_33] : memref<6x8xf32, #tpu.memory_space<smem>>
    %c2_34 = arith.constant 2 : index
    %c5_35 = arith.constant 5 : index
    %21 = memref.load %arg2[%c2_34, %c5_35] : memref<6x8xf32, #tpu.memory_space<smem>>
    %c2_36 = arith.constant 2 : index
    %c6_37 = arith.constant 6 : index
    %22 = memref.load %arg2[%c2_36, %c6_37] : memref<6x8xf32, #tpu.memory_space<smem>>
    %c2_38 = arith.constant 2 : index
    %c7_39 = arith.constant 7 : index
    %23 = memref.load %arg2[%c2_38, %c7_39] : memref<6x8xf32, #tpu.memory_space<smem>>
    %c3_40 = arith.constant 3 : index
    %c0_41 = arith.constant 0 : index
    %24 = memref.load %arg2[%c3_40, %c0_41] : memref<6x8xf32, #tpu.memory_space<smem>>
    %c3_42 = arith.constant 3 : index
    %c1_43 = arith.constant 1 : index
    %25 = memref.load %arg2[%c3_42, %c1_43] : memref<6x8xf32, #tpu.memory_space<smem>>
    %c3_44 = arith.constant 3 : index
    %c2_45 = arith.constant 2 : index
    %26 = memref.load %arg2[%c3_44, %c2_45] : memref<6x8xf32, #tpu.memory_space<smem>>
    %c3_46 = arith.constant 3 : index
    %c3_47 = arith.constant 3 : index
    %27 = memref.load %arg2[%c3_46, %c3_47] : memref<6x8xf32, #tpu.memory_space<smem>>
    %c3_48 = arith.constant 3 : index
    %c4_49 = arith.constant 4 : index
    %28 = memref.load %arg2[%c3_48, %c4_49] : memref<6x8xf32, #tpu.memory_space<smem>>
    %c3_50 = arith.constant 3 : index
    %c5_51 = arith.constant 5 : index
    %29 = memref.load %arg2[%c3_50, %c5_51] : memref<6x8xf32, #tpu.memory_space<smem>>
    %c3_52 = arith.constant 3 : index
    %c6_53 = arith.constant 6 : index
    %30 = memref.load %arg2[%c3_52, %c6_53] : memref<6x8xf32, #tpu.memory_space<smem>>
    %c3_54 = arith.constant 3 : index
    %c7_55 = arith.constant 7 : index
    %31 = memref.load %arg2[%c3_54, %c7_55] : memref<6x8xf32, #tpu.memory_space<smem>>
    %c4_56 = arith.constant 4 : index
    %c0_57 = arith.constant 0 : index
    %32 = memref.load %arg2[%c4_56, %c0_57] : memref<6x8xf32, #tpu.memory_space<smem>>
    %c4_58 = arith.constant 4 : index
    %c1_59 = arith.constant 1 : index
    %33 = memref.load %arg2[%c4_58, %c1_59] : memref<6x8xf32, #tpu.memory_space<smem>>
    %c4_60 = arith.constant 4 : index
    %c2_61 = arith.constant 2 : index
    %34 = memref.load %arg2[%c4_60, %c2_61] : memref<6x8xf32, #tpu.memory_space<smem>>
    %c4_62 = arith.constant 4 : index
    %c3_63 = arith.constant 3 : index
    %35 = memref.load %arg2[%c4_62, %c3_63] : memref<6x8xf32, #tpu.memory_space<smem>>
    %c4_64 = arith.constant 4 : index
    %c4_65 = arith.constant 4 : index
    %36 = memref.load %arg2[%c4_64, %c4_65] : memref<6x8xf32, #tpu.memory_space<smem>>
    %c4_66 = arith.constant 4 : index
    %c5_67 = arith.constant 5 : index
    %37 = memref.load %arg2[%c4_66, %c5_67] : memref<6x8xf32, #tpu.memory_space<smem>>
    %c4_68 = arith.constant 4 : index
    %c6_69 = arith.constant 6 : index
    %38 = memref.load %arg2[%c4_68, %c6_69] : memref<6x8xf32, #tpu.memory_space<smem>>
    %c4_70 = arith.constant 4 : index
    %c7_71 = arith.constant 7 : index
    %39 = memref.load %arg2[%c4_70, %c7_71] : memref<6x8xf32, #tpu.memory_space<smem>>
    %c5_72 = arith.constant 5 : index
    %c0_73 = arith.constant 0 : index
    %40 = memref.load %arg2[%c5_72, %c0_73] : memref<6x8xf32, #tpu.memory_space<smem>>
    %c5_74 = arith.constant 5 : index
    %c1_75 = arith.constant 1 : index
    %41 = memref.load %arg2[%c5_74, %c1_75] : memref<6x8xf32, #tpu.memory_space<smem>>
    %c5_76 = arith.constant 5 : index
    %c2_77 = arith.constant 2 : index
    %42 = memref.load %arg2[%c5_76, %c2_77] : memref<6x8xf32, #tpu.memory_space<smem>>
    %c5_78 = arith.constant 5 : index
    %c3_79 = arith.constant 3 : index
    %43 = memref.load %arg2[%c5_78, %c3_79] : memref<6x8xf32, #tpu.memory_space<smem>>
    %c5_80 = arith.constant 5 : index
    %c4_81 = arith.constant 4 : index
    %44 = memref.load %arg2[%c5_80, %c4_81] : memref<6x8xf32, #tpu.memory_space<smem>>
    %c5_82 = arith.constant 5 : index
    %c5_83 = arith.constant 5 : index
    %45 = memref.load %arg2[%c5_82, %c5_83] : memref<6x8xf32, #tpu.memory_space<smem>>
    %c5_84 = arith.constant 5 : index
    %c6_85 = arith.constant 6 : index
    %46 = memref.load %arg2[%c5_84, %c6_85] : memref<6x8xf32, #tpu.memory_space<smem>>
    %c5_86 = arith.constant 5 : index
    %c7_87 = arith.constant 7 : index
    %47 = memref.load %arg2[%c5_86, %c7_87] : memref<6x8xf32, #tpu.memory_space<smem>>
    %c0_88 = arith.constant 0 : index
    %48 = memref.load %arg3[%c0_88] : memref<6xf32, #tpu.memory_space<smem>>
    %c1_89 = arith.constant 1 : index
    %49 = memref.load %arg3[%c1_89] : memref<6xf32, #tpu.memory_space<smem>>
    %c2_90 = arith.constant 2 : index
    %50 = memref.load %arg3[%c2_90] : memref<6xf32, #tpu.memory_space<smem>>
    %c3_91 = arith.constant 3 : index
    %51 = memref.load %arg3[%c3_91] : memref<6xf32, #tpu.memory_space<smem>>
    %c4_92 = arith.constant 4 : index
    %52 = memref.load %arg3[%c4_92] : memref<6xf32, #tpu.memory_space<smem>>
    %c5_93 = arith.constant 5 : index
    %53 = memref.load %arg3[%c5_93] : memref<6xf32, #tpu.memory_space<smem>>
    %c0_94 = arith.constant 0 : index
    %c0_95 = arith.constant 0 : index
    %54 = memref.load %arg4[%c0_94, %c0_95] : memref<4x6xf32, #tpu.memory_space<smem>>
    %c0_96 = arith.constant 0 : index
    %c1_97 = arith.constant 1 : index
    %55 = memref.load %arg4[%c0_96, %c1_97] : memref<4x6xf32, #tpu.memory_space<smem>>
    %c0_98 = arith.constant 0 : index
    %c2_99 = arith.constant 2 : index
    %56 = memref.load %arg4[%c0_98, %c2_99] : memref<4x6xf32, #tpu.memory_space<smem>>
    %c0_100 = arith.constant 0 : index
    %c3_101 = arith.constant 3 : index
    %57 = memref.load %arg4[%c0_100, %c3_101] : memref<4x6xf32, #tpu.memory_space<smem>>
    %c0_102 = arith.constant 0 : index
    %c4_103 = arith.constant 4 : index
    %58 = memref.load %arg4[%c0_102, %c4_103] : memref<4x6xf32, #tpu.memory_space<smem>>
    %c0_104 = arith.constant 0 : index
    %c5_105 = arith.constant 5 : index
    %59 = memref.load %arg4[%c0_104, %c5_105] : memref<4x6xf32, #tpu.memory_space<smem>>
    %c1_106 = arith.constant 1 : index
    %c0_107 = arith.constant 0 : index
    %60 = memref.load %arg4[%c1_106, %c0_107] : memref<4x6xf32, #tpu.memory_space<smem>>
    %c1_108 = arith.constant 1 : index
    %c1_109 = arith.constant 1 : index
    %61 = memref.load %arg4[%c1_108, %c1_109] : memref<4x6xf32, #tpu.memory_space<smem>>
    %c1_110 = arith.constant 1 : index
    %c2_111 = arith.constant 2 : index
    %62 = memref.load %arg4[%c1_110, %c2_111] : memref<4x6xf32, #tpu.memory_space<smem>>
    %c1_112 = arith.constant 1 : index
    %c3_113 = arith.constant 3 : index
    %63 = memref.load %arg4[%c1_112, %c3_113] : memref<4x6xf32, #tpu.memory_space<smem>>
    %c1_114 = arith.constant 1 : index
    %c4_115 = arith.constant 4 : index
    %64 = memref.load %arg4[%c1_114, %c4_115] : memref<4x6xf32, #tpu.memory_space<smem>>
    %c1_116 = arith.constant 1 : index
    %c5_117 = arith.constant 5 : index
    %65 = memref.load %arg4[%c1_116, %c5_117] : memref<4x6xf32, #tpu.memory_space<smem>>
    %c2_118 = arith.constant 2 : index
    %c0_119 = arith.constant 0 : index
    %66 = memref.load %arg4[%c2_118, %c0_119] : memref<4x6xf32, #tpu.memory_space<smem>>
    %c2_120 = arith.constant 2 : index
    %c1_121 = arith.constant 1 : index
    %67 = memref.load %arg4[%c2_120, %c1_121] : memref<4x6xf32, #tpu.memory_space<smem>>
    %c2_122 = arith.constant 2 : index
    %c2_123 = arith.constant 2 : index
    %68 = memref.load %arg4[%c2_122, %c2_123] : memref<4x6xf32, #tpu.memory_space<smem>>
    %c2_124 = arith.constant 2 : index
    %c3_125 = arith.constant 3 : index
    %69 = memref.load %arg4[%c2_124, %c3_125] : memref<4x6xf32, #tpu.memory_space<smem>>
    %c2_126 = arith.constant 2 : index
    %c4_127 = arith.constant 4 : index
    %70 = memref.load %arg4[%c2_126, %c4_127] : memref<4x6xf32, #tpu.memory_space<smem>>
    %c2_128 = arith.constant 2 : index
    %c5_129 = arith.constant 5 : index
    %71 = memref.load %arg4[%c2_128, %c5_129] : memref<4x6xf32, #tpu.memory_space<smem>>
    %c3_130 = arith.constant 3 : index
    %c0_131 = arith.constant 0 : index
    %72 = memref.load %arg4[%c3_130, %c0_131] : memref<4x6xf32, #tpu.memory_space<smem>>
    %c3_132 = arith.constant 3 : index
    %c1_133 = arith.constant 1 : index
    %73 = memref.load %arg4[%c3_132, %c1_133] : memref<4x6xf32, #tpu.memory_space<smem>>
    %c3_134 = arith.constant 3 : index
    %c2_135 = arith.constant 2 : index
    %74 = memref.load %arg4[%c3_134, %c2_135] : memref<4x6xf32, #tpu.memory_space<smem>>
    %c3_136 = arith.constant 3 : index
    %c3_137 = arith.constant 3 : index
    %75 = memref.load %arg4[%c3_136, %c3_137] : memref<4x6xf32, #tpu.memory_space<smem>>
    %c3_138 = arith.constant 3 : index
    %c4_139 = arith.constant 4 : index
    %76 = memref.load %arg4[%c3_138, %c4_139] : memref<4x6xf32, #tpu.memory_space<smem>>
    %c3_140 = arith.constant 3 : index
    %c5_141 = arith.constant 5 : index
    %77 = memref.load %arg4[%c3_140, %c5_141] : memref<4x6xf32, #tpu.memory_space<smem>>
    %c0_142 = arith.constant 0 : index
    %78 = memref.load %arg5[%c0_142] : memref<4xf32, #tpu.memory_space<smem>>
    %c1_143 = arith.constant 1 : index
    %79 = memref.load %arg5[%c1_143] : memref<4xf32, #tpu.memory_space<smem>>
    %c2_144 = arith.constant 2 : index
    %80 = memref.load %arg5[%c2_144] : memref<4xf32, #tpu.memory_space<smem>>
    %c3_145 = arith.constant 3 : index
    %81 = memref.load %arg5[%c3_145] : memref<4xf32, #tpu.memory_space<smem>>
    %c0_146 = arith.constant 0 : index
    %c0_147 = arith.constant 0 : index
    %82 = memref.load %arg6[%c0_146, %c0_147] : memref<1x4xf32, #tpu.memory_space<smem>>
    %c0_148 = arith.constant 0 : index
    %c1_149 = arith.constant 1 : index
    %83 = memref.load %arg6[%c0_148, %c1_149] : memref<1x4xf32, #tpu.memory_space<smem>>
    %c0_150 = arith.constant 0 : index
    %c2_151 = arith.constant 2 : index
    %84 = memref.load %arg6[%c0_150, %c2_151] : memref<1x4xf32, #tpu.memory_space<smem>>
    %c0_152 = arith.constant 0 : index
    %c3_153 = arith.constant 3 : index
    %85 = memref.load %arg6[%c0_152, %c3_153] : memref<1x4xf32, #tpu.memory_space<smem>>
    %c0_154 = arith.constant 0 : index
    %86 = memref.load %arg7[%c0_154] : memref<1xf32, #tpu.memory_space<smem>>
    %c0_i32 = arith.constant 0 : i32
    %c8_i32 = arith.constant 8 : i32
    %87 = arith.muli %c0_i32, %c8_i32 : i32
    %88 = tpu.assume_multiple %87, 8 : i32
    %c0_155 = arith.constant 0 : index
    %89 = arith.index_cast %88 : i32 to index
    %c0_156 = arith.constant 0 : index
    %90 = vector.load %arg1[%c0_155, %89, %c0_156] : memref<8x8x128xf32, #tpu.memory_space<vmem>>, vector<1x8x128xf32>
    %91 = vector.shape_cast %90 : vector<1x8x128xf32> to vector<8x128xf32>
    %c1_157 = arith.constant 1 : index
    %92 = arith.index_cast %88 : i32 to index
    %c0_158 = arith.constant 0 : index
    %93 = vector.load %arg1[%c1_157, %92, %c0_158] : memref<8x8x128xf32, #tpu.memory_space<vmem>>, vector<1x8x128xf32>
    %94 = vector.shape_cast %93 : vector<1x8x128xf32> to vector<8x128xf32>
    %c2_159 = arith.constant 2 : index
    %95 = arith.index_cast %88 : i32 to index
    %c0_160 = arith.constant 0 : index
    %96 = vector.load %arg1[%c2_159, %95, %c0_160] : memref<8x8x128xf32, #tpu.memory_space<vmem>>, vector<1x8x128xf32>
    %97 = vector.shape_cast %96 : vector<1x8x128xf32> to vector<8x128xf32>
    %c3_161 = arith.constant 3 : index
    %98 = arith.index_cast %88 : i32 to index
    %c0_162 = arith.constant 0 : index
    %99 = vector.load %arg1[%c3_161, %98, %c0_162] : memref<8x8x128xf32, #tpu.memory_space<vmem>>, vector<1x8x128xf32>
    %100 = vector.shape_cast %99 : vector<1x8x128xf32> to vector<8x128xf32>
    %c4_163 = arith.constant 4 : index
    %101 = arith.index_cast %88 : i32 to index
    %c0_164 = arith.constant 0 : index
    %102 = vector.load %arg1[%c4_163, %101, %c0_164] : memref<8x8x128xf32, #tpu.memory_space<vmem>>, vector<1x8x128xf32>
    %103 = vector.shape_cast %102 : vector<1x8x128xf32> to vector<8x128xf32>
    %c5_165 = arith.constant 5 : index
    %104 = arith.index_cast %88 : i32 to index
    %c0_166 = arith.constant 0 : index
    %105 = vector.load %arg1[%c5_165, %104, %c0_166] : memref<8x8x128xf32, #tpu.memory_space<vmem>>, vector<1x8x128xf32>
    %106 = vector.shape_cast %105 : vector<1x8x128xf32> to vector<8x128xf32>
    %c6_167 = arith.constant 6 : index
    %107 = arith.index_cast %88 : i32 to index
    %c0_168 = arith.constant 0 : index
    %108 = vector.load %arg1[%c6_167, %107, %c0_168] : memref<8x8x128xf32, #tpu.memory_space<vmem>>, vector<1x8x128xf32>
    %109 = vector.shape_cast %108 : vector<1x8x128xf32> to vector<8x128xf32>
    %c7_169 = arith.constant 7 : index
    %110 = arith.index_cast %88 : i32 to index
    %c0_170 = arith.constant 0 : index
    %111 = vector.load %arg1[%c7_169, %110, %c0_170] : memref<8x8x128xf32, #tpu.memory_space<vmem>>, vector<1x8x128xf32>
    %112 = vector.shape_cast %111 : vector<1x8x128xf32> to vector<8x128xf32>
    %113 = vector.broadcast %0 : f32 to vector<8x128xf32>
    %114 = arith.mulf %91, %113 : vector<8x128xf32>
    %115 = vector.broadcast %1 : f32 to vector<8x128xf32>
    %116 = arith.mulf %94, %115 : vector<8x128xf32>
    %117 = arith.addf %114, %116 : vector<8x128xf32>
    %118 = vector.broadcast %2 : f32 to vector<8x128xf32>
    %119 = arith.mulf %97, %118 : vector<8x128xf32>
    %120 = arith.addf %117, %119 : vector<8x128xf32>
    %121 = vector.broadcast %3 : f32 to vector<8x128xf32>
    %122 = arith.mulf %100, %121 : vector<8x128xf32>
    %123 = arith.addf %120, %122 : vector<8x128xf32>
    %124 = vector.broadcast %4 : f32 to vector<8x128xf32>
    %125 = arith.mulf %103, %124 : vector<8x128xf32>
    %126 = arith.addf %123, %125 : vector<8x128xf32>
    %127 = vector.broadcast %5 : f32 to vector<8x128xf32>
    %128 = arith.mulf %106, %127 : vector<8x128xf32>
    %129 = arith.addf %126, %128 : vector<8x128xf32>
    %130 = vector.broadcast %6 : f32 to vector<8x128xf32>
    %131 = arith.mulf %109, %130 : vector<8x128xf32>
    %132 = arith.addf %129, %131 : vector<8x128xf32>
    %133 = vector.broadcast %7 : f32 to vector<8x128xf32>
    %134 = arith.mulf %112, %133 : vector<8x128xf32>
    %135 = arith.addf %132, %134 : vector<8x128xf32>
    %136 = vector.broadcast %48 : f32 to vector<8x128xf32>
    %137 = arith.addf %135, %136 : vector<8x128xf32>
    %cst = arith.constant 0.000000e+00 : f32
    %138 = vector.broadcast %cst : f32 to vector<8x128xf32>
    %139 = arith.maximumf %137, %138 : vector<8x128xf32>
    %140 = vector.broadcast %8 : f32 to vector<8x128xf32>
    %141 = arith.mulf %91, %140 : vector<8x128xf32>
    %142 = vector.broadcast %9 : f32 to vector<8x128xf32>
    %143 = arith.mulf %94, %142 : vector<8x128xf32>
    %144 = arith.addf %141, %143 : vector<8x128xf32>
    %145 = vector.broadcast %10 : f32 to vector<8x128xf32>
    %146 = arith.mulf %97, %145 : vector<8x128xf32>
    %147 = arith.addf %144, %146 : vector<8x128xf32>
    %148 = vector.broadcast %11 : f32 to vector<8x128xf32>
    %149 = arith.mulf %100, %148 : vector<8x128xf32>
    %150 = arith.addf %147, %149 : vector<8x128xf32>
    %151 = vector.broadcast %12 : f32 to vector<8x128xf32>
    %152 = arith.mulf %103, %151 : vector<8x128xf32>
    %153 = arith.addf %150, %152 : vector<8x128xf32>
    %154 = vector.broadcast %13 : f32 to vector<8x128xf32>
    %155 = arith.mulf %106, %154 : vector<8x128xf32>
    %156 = arith.addf %153, %155 : vector<8x128xf32>
    %157 = vector.broadcast %14 : f32 to vector<8x128xf32>
    %158 = arith.mulf %109, %157 : vector<8x128xf32>
    %159 = arith.addf %156, %158 : vector<8x128xf32>
    %160 = vector.broadcast %15 : f32 to vector<8x128xf32>
    %161 = arith.mulf %112, %160 : vector<8x128xf32>
    %162 = arith.addf %159, %161 : vector<8x128xf32>
    %163 = vector.broadcast %49 : f32 to vector<8x128xf32>
    %164 = arith.addf %162, %163 : vector<8x128xf32>
    %cst_171 = arith.constant 0.000000e+00 : f32
    %165 = vector.broadcast %cst_171 : f32 to vector<8x128xf32>
    %166 = arith.maximumf %164, %165 : vector<8x128xf32>
    %167 = vector.broadcast %16 : f32 to vector<8x128xf32>
    %168 = arith.mulf %91, %167 : vector<8x128xf32>
    %169 = vector.broadcast %17 : f32 to vector<8x128xf32>
    %170 = arith.mulf %94, %169 : vector<8x128xf32>
    %171 = arith.addf %168, %170 : vector<8x128xf32>
    %172 = vector.broadcast %18 : f32 to vector<8x128xf32>
    %173 = arith.mulf %97, %172 : vector<8x128xf32>
    %174 = arith.addf %171, %173 : vector<8x128xf32>
    %175 = vector.broadcast %19 : f32 to vector<8x128xf32>
    %176 = arith.mulf %100, %175 : vector<8x128xf32>
    %177 = arith.addf %174, %176 : vector<8x128xf32>
    %178 = vector.broadcast %20 : f32 to vector<8x128xf32>
    %179 = arith.mulf %103, %178 : vector<8x128xf32>
    %180 = arith.addf %177, %179 : vector<8x128xf32>
    %181 = vector.broadcast %21 : f32 to vector<8x128xf32>
    %182 = arith.mulf %106, %181 : vector<8x128xf32>
    %183 = arith.addf %180, %182 : vector<8x128xf32>
    %184 = vector.broadcast %22 : f32 to vector<8x128xf32>
    %185 = arith.mulf %109, %184 : vector<8x128xf32>
    %186 = arith.addf %183, %185 : vector<8x128xf32>
    %187 = vector.broadcast %23 : f32 to vector<8x128xf32>
    %188 = arith.mulf %112, %187 : vector<8x128xf32>
    %189 = arith.addf %186, %188 : vector<8x128xf32>
    %190 = vector.broadcast %50 : f32 to vector<8x128xf32>
    %191 = arith.addf %189, %190 : vector<8x128xf32>
    %cst_172 = arith.constant 0.000000e+00 : f32
    %192 = vector.broadcast %cst_172 : f32 to vector<8x128xf32>
    %193 = arith.maximumf %191, %192 : vector<8x128xf32>
    %194 = vector.broadcast %24 : f32 to vector<8x128xf32>
    %195 = arith.mulf %91, %194 : vector<8x128xf32>
    %196 = vector.broadcast %25 : f32 to vector<8x128xf32>
    %197 = arith.mulf %94, %196 : vector<8x128xf32>
    %198 = arith.addf %195, %197 : vector<8x128xf32>
    %199 = vector.broadcast %26 : f32 to vector<8x128xf32>
    %200 = arith.mulf %97, %199 : vector<8x128xf32>
    %201 = arith.addf %198, %200 : vector<8x128xf32>
    %202 = vector.broadcast %27 : f32 to vector<8x128xf32>
    %203 = arith.mulf %100, %202 : vector<8x128xf32>
    %204 = arith.addf %201, %203 : vector<8x128xf32>
    %205 = vector.broadcast %28 : f32 to vector<8x128xf32>
    %206 = arith.mulf %103, %205 : vector<8x128xf32>
    %207 = arith.addf %204, %206 : vector<8x128xf32>
    %208 = vector.broadcast %29 : f32 to vector<8x128xf32>
    %209 = arith.mulf %106, %208 : vector<8x128xf32>
    %210 = arith.addf %207, %209 : vector<8x128xf32>
    %211 = vector.broadcast %30 : f32 to vector<8x128xf32>
    %212 = arith.mulf %109, %211 : vector<8x128xf32>
    %213 = arith.addf %210, %212 : vector<8x128xf32>
    %214 = vector.broadcast %31 : f32 to vector<8x128xf32>
    %215 = arith.mulf %112, %214 : vector<8x128xf32>
    %216 = arith.addf %213, %215 : vector<8x128xf32>
    %217 = vector.broadcast %51 : f32 to vector<8x128xf32>
    %218 = arith.addf %216, %217 : vector<8x128xf32>
    %cst_173 = arith.constant 0.000000e+00 : f32
    %219 = vector.broadcast %cst_173 : f32 to vector<8x128xf32>
    %220 = arith.maximumf %218, %219 : vector<8x128xf32>
    %221 = vector.broadcast %32 : f32 to vector<8x128xf32>
    %222 = arith.mulf %91, %221 : vector<8x128xf32>
    %223 = vector.broadcast %33 : f32 to vector<8x128xf32>
    %224 = arith.mulf %94, %223 : vector<8x128xf32>
    %225 = arith.addf %222, %224 : vector<8x128xf32>
    %226 = vector.broadcast %34 : f32 to vector<8x128xf32>
    %227 = arith.mulf %97, %226 : vector<8x128xf32>
    %228 = arith.addf %225, %227 : vector<8x128xf32>
    %229 = vector.broadcast %35 : f32 to vector<8x128xf32>
    %230 = arith.mulf %100, %229 : vector<8x128xf32>
    %231 = arith.addf %228, %230 : vector<8x128xf32>
    %232 = vector.broadcast %36 : f32 to vector<8x128xf32>
    %233 = arith.mulf %103, %232 : vector<8x128xf32>
    %234 = arith.addf %231, %233 : vector<8x128xf32>
    %235 = vector.broadcast %37 : f32 to vector<8x128xf32>
    %236 = arith.mulf %106, %235 : vector<8x128xf32>
    %237 = arith.addf %234, %236 : vector<8x128xf32>
    %238 = vector.broadcast %38 : f32 to vector<8x128xf32>
    %239 = arith.mulf %109, %238 : vector<8x128xf32>
    %240 = arith.addf %237, %239 : vector<8x128xf32>
    %241 = vector.broadcast %39 : f32 to vector<8x128xf32>
    %242 = arith.mulf %112, %241 : vector<8x128xf32>
    %243 = arith.addf %240, %242 : vector<8x128xf32>
    %244 = vector.broadcast %52 : f32 to vector<8x128xf32>
    %245 = arith.addf %243, %244 : vector<8x128xf32>
    %cst_174 = arith.constant 0.000000e+00 : f32
    %246 = vector.broadcast %cst_174 : f32 to vector<8x128xf32>
    %247 = arith.maximumf %245, %246 : vector<8x128xf32>
    %248 = vector.broadcast %40 : f32 to vector<8x128xf32>
    %249 = arith.mulf %91, %248 : vector<8x128xf32>
    %250 = vector.broadcast %41 : f32 to vector<8x128xf32>
    %251 = arith.mulf %94, %250 : vector<8x128xf32>
    %252 = arith.addf %249, %251 : vector<8x128xf32>
    %253 = vector.broadcast %42 : f32 to vector<8x128xf32>
    %254 = arith.mulf %97, %253 : vector<8x128xf32>
    %255 = arith.addf %252, %254 : vector<8x128xf32>
    %256 = vector.broadcast %43 : f32 to vector<8x128xf32>
    %257 = arith.mulf %100, %256 : vector<8x128xf32>
    %258 = arith.addf %255, %257 : vector<8x128xf32>
    %259 = vector.broadcast %44 : f32 to vector<8x128xf32>
    %260 = arith.mulf %103, %259 : vector<8x128xf32>
    %261 = arith.addf %258, %260 : vector<8x128xf32>
    %262 = vector.broadcast %45 : f32 to vector<8x128xf32>
    %263 = arith.mulf %106, %262 : vector<8x128xf32>
    %264 = arith.addf %261, %263 : vector<8x128xf32>
    %265 = vector.broadcast %46 : f32 to vector<8x128xf32>
    %266 = arith.mulf %109, %265 : vector<8x128xf32>
    %267 = arith.addf %264, %266 : vector<8x128xf32>
    %268 = vector.broadcast %47 : f32 to vector<8x128xf32>
    %269 = arith.mulf %112, %268 : vector<8x128xf32>
    %270 = arith.addf %267, %269 : vector<8x128xf32>
    %271 = vector.broadcast %53 : f32 to vector<8x128xf32>
    %272 = arith.addf %270, %271 : vector<8x128xf32>
    %cst_175 = arith.constant 0.000000e+00 : f32
    %273 = vector.broadcast %cst_175 : f32 to vector<8x128xf32>
    %274 = arith.maximumf %272, %273 : vector<8x128xf32>
    %275 = vector.broadcast %54 : f32 to vector<8x128xf32>
    %276 = arith.mulf %139, %275 : vector<8x128xf32>
    %277 = vector.broadcast %55 : f32 to vector<8x128xf32>
    %278 = arith.mulf %166, %277 : vector<8x128xf32>
    %279 = arith.addf %276, %278 : vector<8x128xf32>
    %280 = vector.broadcast %56 : f32 to vector<8x128xf32>
    %281 = arith.mulf %193, %280 : vector<8x128xf32>
    %282 = arith.addf %279, %281 : vector<8x128xf32>
    %283 = vector.broadcast %57 : f32 to vector<8x128xf32>
    %284 = arith.mulf %220, %283 : vector<8x128xf32>
    %285 = arith.addf %282, %284 : vector<8x128xf32>
    %286 = vector.broadcast %58 : f32 to vector<8x128xf32>
    %287 = arith.mulf %247, %286 : vector<8x128xf32>
    %288 = arith.addf %285, %287 : vector<8x128xf32>
    %289 = vector.broadcast %59 : f32 to vector<8x128xf32>
    %290 = arith.mulf %274, %289 : vector<8x128xf32>
    %291 = arith.addf %288, %290 : vector<8x128xf32>
    %292 = vector.broadcast %78 : f32 to vector<8x128xf32>
    %293 = arith.addf %291, %292 : vector<8x128xf32>
    %cst_176 = arith.constant 0.000000e+00 : f32
    %294 = vector.broadcast %cst_176 : f32 to vector<8x128xf32>
    %295 = arith.maximumf %293, %294 : vector<8x128xf32>
    %296 = vector.broadcast %60 : f32 to vector<8x128xf32>
    %297 = arith.mulf %139, %296 : vector<8x128xf32>
    %298 = vector.broadcast %61 : f32 to vector<8x128xf32>
    %299 = arith.mulf %166, %298 : vector<8x128xf32>
    %300 = arith.addf %297, %299 : vector<8x128xf32>
    %301 = vector.broadcast %62 : f32 to vector<8x128xf32>
    %302 = arith.mulf %193, %301 : vector<8x128xf32>
    %303 = arith.addf %300, %302 : vector<8x128xf32>
    %304 = vector.broadcast %63 : f32 to vector<8x128xf32>
    %305 = arith.mulf %220, %304 : vector<8x128xf32>
    %306 = arith.addf %303, %305 : vector<8x128xf32>
    %307 = vector.broadcast %64 : f32 to vector<8x128xf32>
    %308 = arith.mulf %247, %307 : vector<8x128xf32>
    %309 = arith.addf %306, %308 : vector<8x128xf32>
    %310 = vector.broadcast %65 : f32 to vector<8x128xf32>
    %311 = arith.mulf %274, %310 : vector<8x128xf32>
    %312 = arith.addf %309, %311 : vector<8x128xf32>
    %313 = vector.broadcast %79 : f32 to vector<8x128xf32>
    %314 = arith.addf %312, %313 : vector<8x128xf32>
    %cst_177 = arith.constant 0.000000e+00 : f32
    %315 = vector.broadcast %cst_177 : f32 to vector<8x128xf32>
    %316 = arith.maximumf %314, %315 : vector<8x128xf32>
    %317 = vector.broadcast %66 : f32 to vector<8x128xf32>
    %318 = arith.mulf %139, %317 : vector<8x128xf32>
    %319 = vector.broadcast %67 : f32 to vector<8x128xf32>
    %320 = arith.mulf %166, %319 : vector<8x128xf32>
    %321 = arith.addf %318, %320 : vector<8x128xf32>
    %322 = vector.broadcast %68 : f32 to vector<8x128xf32>
    %323 = arith.mulf %193, %322 : vector<8x128xf32>
    %324 = arith.addf %321, %323 : vector<8x128xf32>
    %325 = vector.broadcast %69 : f32 to vector<8x128xf32>
    %326 = arith.mulf %220, %325 : vector<8x128xf32>
    %327 = arith.addf %324, %326 : vector<8x128xf32>
    %328 = vector.broadcast %70 : f32 to vector<8x128xf32>
    %329 = arith.mulf %247, %328 : vector<8x128xf32>
    %330 = arith.addf %327, %329 : vector<8x128xf32>
    %331 = vector.broadcast %71 : f32 to vector<8x128xf32>
    %332 = arith.mulf %274, %331 : vector<8x128xf32>
    %333 = arith.addf %330, %332 : vector<8x128xf32>
    %334 = vector.broadcast %80 : f32 to vector<8x128xf32>
    %335 = arith.addf %333, %334 : vector<8x128xf32>
    %cst_178 = arith.constant 0.000000e+00 : f32
    %336 = vector.broadcast %cst_178 : f32 to vector<8x128xf32>
    %337 = arith.maximumf %335, %336 : vector<8x128xf32>
    %338 = vector.broadcast %72 : f32 to vector<8x128xf32>
    %339 = arith.mulf %139, %338 : vector<8x128xf32>
    %340 = vector.broadcast %73 : f32 to vector<8x128xf32>
    %341 = arith.mulf %166, %340 : vector<8x128xf32>
    %342 = arith.addf %339, %341 : vector<8x128xf32>
    %343 = vector.broadcast %74 : f32 to vector<8x128xf32>
    %344 = arith.mulf %193, %343 : vector<8x128xf32>
    %345 = arith.addf %342, %344 : vector<8x128xf32>
    %346 = vector.broadcast %75 : f32 to vector<8x128xf32>
    %347 = arith.mulf %220, %346 : vector<8x128xf32>
    %348 = arith.addf %345, %347 : vector<8x128xf32>
    %349 = vector.broadcast %76 : f32 to vector<8x128xf32>
    %350 = arith.mulf %247, %349 : vector<8x128xf32>
    %351 = arith.addf %348, %350 : vector<8x128xf32>
    %352 = vector.broadcast %77 : f32 to vector<8x128xf32>
    %353 = arith.mulf %274, %352 : vector<8x128xf32>
    %354 = arith.addf %351, %353 : vector<8x128xf32>
    %355 = vector.broadcast %81 : f32 to vector<8x128xf32>
    %356 = arith.addf %354, %355 : vector<8x128xf32>
    %cst_179 = arith.constant 0.000000e+00 : f32
    %357 = vector.broadcast %cst_179 : f32 to vector<8x128xf32>
    %358 = arith.maximumf %356, %357 : vector<8x128xf32>
    %359 = vector.broadcast %82 : f32 to vector<8x128xf32>
    %360 = arith.mulf %295, %359 : vector<8x128xf32>
    %361 = vector.broadcast %83 : f32 to vector<8x128xf32>
    %362 = arith.mulf %316, %361 : vector<8x128xf32>
    %363 = arith.addf %360, %362 : vector<8x128xf32>
    %364 = vector.broadcast %84 : f32 to vector<8x128xf32>
    %365 = arith.mulf %337, %364 : vector<8x128xf32>
    %366 = arith.addf %363, %365 : vector<8x128xf32>
    %367 = vector.broadcast %85 : f32 to vector<8x128xf32>
    %368 = arith.mulf %358, %367 : vector<8x128xf32>
    %369 = arith.addf %366, %368 : vector<8x128xf32>
    %370 = vector.broadcast %86 : f32 to vector<8x128xf32>
    %371 = arith.addf %369, %370 : vector<8x128xf32>
    %372 = math.absf %371 : vector<8x128xf32>
    %cst_180 = arith.constant 0.000000e+00 : f32
    %373 = vector.broadcast %cst_180 : f32 to vector<8x128xf32>
    %374 = arith.subf %373, %372 : vector<8x128xf32>
    %375 = math.exp %374 : vector<8x128xf32>
    %cst_181 = arith.constant 1.000000e+00 : f32
    %376 = vector.broadcast %cst_181 : f32 to vector<8x128xf32>
    %377 = arith.addf %376, %375 : vector<8x128xf32>
    %cst_182 = arith.constant 1.000000e+00 : f32
    %378 = vector.broadcast %cst_182 : f32 to vector<8x128xf32>
    %379 = arith.divf %378, %377 : vector<8x128xf32>
    %cst_183 = arith.constant 0.000000e+00 : f32
    %380 = vector.broadcast %cst_183 : f32 to vector<8x128xf32>
    %381 = arith.cmpf oge, %371, %380 : vector<8x128xf32>
    %382 = arith.mulf %375, %379 : vector<8x128xf32>
    %383 = arith.select %381, %379, %382 : vector<8x128xi1>, vector<8x128xf32>
    %384 = arith.index_cast %88 : i32 to index
    %c0_184 = arith.constant 0 : index
    %385 = vector.load %arg8[%384, %c0_184] : memref<8x128xf32, #tpu.memory_space<vmem>>, vector<8x128xf32>
    tpu.vector_store %arg8[%384, %c0_184], %383 {strides = array<i32>} : memref<8x128xf32, #tpu.memory_space<vmem>>, vector<8x128xf32>,
    %c1_i32 = arith.constant 1 : i32
    return
  }
  func.func @transform_0(%arg0: i32) -> (i32, i32, i32) {
    %c0_i32 = arith.constant 0 : i32
    %c0_i32_0 = arith.constant 0 : i32
    %c0_i32_1 = arith.constant 0 : i32
    return %c0_i32, %arg0, %c0_i32_0 : i32, i32, i32
  }
  func.func @transform_1(%arg0: i32) -> (i32, i32) {
    %c0_i32 = arith.constant 0 : i32
    %c0_i32_0 = arith.constant 0 : i32
    %c0_i32_1 = arith.constant 0 : i32
    return %c0_i32, %c0_i32_0 : i32, i32
  }
  func.func @transform_2(%arg0: i32) -> i32 {
    %c0_i32 = arith.constant 0 : i32
    %c0_i32_0 = arith.constant 0 : i32
    return %c0_i32 : i32
  }
  func.func @transform_3(%arg0: i32) -> (i32, i32) {
    %c0_i32 = arith.constant 0 : i32
    %c0_i32_0 = arith.constant 0 : i32
    %c0_i32_1 = arith.constant 0 : i32
    return %c0_i32, %c0_i32_0 : i32, i32
  }
  func.func @transform_4(%arg0: i32) -> i32 {
    %c0_i32 = arith.constant 0 : i32
    %c0_i32_0 = arith.constant 0 : i32
    return %c0_i32 : i32
  }
  func.func @transform_5(%arg0: i32) -> (i32, i32) {
    %c0_i32 = arith.constant 0 : i32
    %c0_i32_0 = arith.constant 0 : i32
    %c0_i32_1 = arith.constant 0 : i32
    return %c0_i32, %c0_i32_0 : i32, i32
  }
  func.func @transform_6(%arg0: i32) -> i32 {
    %c0_i32 = arith.constant 0 : i32
    %c0_i32_0 = arith.constant 0 : i32
    return %c0_i32 : i32
  }
  func.func @transform_7(%arg0: i32) -> (i32, i32) {
    %c0_i32 = arith.constant 0 : i32
    %c0_i32_0 = arith.constant 0 : i32
    return %arg0, %c0_i32 : i32, i32
  }
}

</mosaic_0001>

<bundles_post_ra>
// kernel: tpu_custom_call.1
= control target key start
LH: loop header
LB: loop body
LE: loop exit
PB: predicated region body
PF: predicated region fallthrough
CT: control target
= control target key end

     0   :  { %s1930_s0 = inlined_call_operand.hbm [shape: f32[8,16,128], index: 0, kind: input, shape index: {}]   ;;  %s1931_s1 = inlined_call_operand.hbm [shape: f32[6,8], index: 1, kind: input, shape index: {}]   ;;  %s1932_s2 = inlined_call_operand.vmem [shape: f32[6], index: 2, kind: input, shape index: {}]   ;;  %s1933_s3 = inlined_call_operand.vmem [shape: f32[4,6], index: 3, kind: input, shape index: {}]   ;;  %s1934_s4 = inlined_call_operand.vmem [shape: f32[4], index: 4, kind: input, shape index: {}]   ;;  %s1935_s5 = inlined_call_operand.vmem [shape: f32[1,4], index: 5, kind: input, shape index: {}]   ;;  %s1936_s6 = inlined_call_operand.<no memory space> [shape: f32[1], index: 6, kind: input, shape index: {}]   ;;  %s1937_s7 = inlined_call_operand.hbm [shape: f32[16,128], index: 7, kind: output, shape index: {}]  }
   0x1   :  { %1941 = sst [smem:[#allocation22_spill]] %s1930_s0 }
   0x2   :  { %1942 = sst [smem:[#allocation23_spill]] %s1931_s1 }
   0x3   :  { %1943 = sst [smem:[#allocation24_spill]] %s1932_s2 }
   0x4   :  { %1944 = sst [smem:[#allocation25_spill]] %s1933_s3 }
   0x5   :  { %1945 = sst [smem:[#allocation26_spill]] %s1934_s4 }
   0x6   :  { %12 = sst [smem:[#allocation2]] %s1936_s6 }
   0x7   :  { %13 = vsyncpa [#allocation4], 0 }
   0x8   :  { %15 = vsyncpa [#allocation4 + $0x1], 0 }
   0x9   :  { %16 = vsyncpa [#allocation6], 0 }
   0xa   :  { %17 = vsyncpa [#allocation7], 0 }
   0xb   :  { %18 = vsyncpa [#allocation11], 0 }
   0xc   :  { %19 = vsyncpa [#allocation14], 0 }
   0xd   :  { %20 = vsyncpa [#allocation5], 0 }
   0xe   :  { %22 = vsyncpa [#allocation5 + $0x1], 0  ;;  %s1327_s26 = smov 0   ;;  %s1329_s27 = smov 0  }
   0xf   :  { %s1331_s28 = smov 0   ;;  %s1333_s29 = smov 0  }
  0x10 LB: > { %s1348_s6 = sadd.s32 4294967295, %s1272_s29   ;;  %s873_s30 = sadd.s32 4294967294, %s1272_s29   ;;  %s1272_s29 = sphi %s1333_s29, %s1974_s29   ;;  %s1268_s28 = sphi %s1331_s28, %s1973_s28   ;;  %s1264_s27 = sphi %s1329_s27, %s1972_s27   ;;  %s1260_s26 = sphi %s1327_s26, %s1971_s26  }
  0x11   : > { %p48_p0 = scmp.ne.s32.totalorder %s1264_s27, %s1260_s26  ;;  %p1938_p1 = scmp.eq.s32.totalorder %s1348_s6, 0 }
  0x12   : > { %p204_p3 = scmp.eq.s32.totalorder %s873_s30, 1  ;;  %p874_p5 = scmp.ge.s32.totalorder %s1272_s29, 1 }
  0x13   : > { %p1357_p4 = por %p1938_p1, %p48_p0  ;;  %p211_p7 = scmp.lt.s32.totalorder %s1272_s29, 3 }
  0x14   : > { %p1362_p6 = por %p204_p3, %p48_p0  ;;  %s1948_s3 = sld [smem:[#allocation25_spill]] }
  0x15   : > { %s1946_s8 = scalar_select %p1357_p4, 1, 0 }
  0x16   : > { %s1947_s9 = scalar_select %p1362_p6, 1, 0 }
  0x17   : > { %p1370_p8 = pnand %p874_p5, %p211_p7  ;;  %s1950_s2 = sld [smem:[#allocation24_spill]] }
  0x18   : > { %s1952_s4 = sld [smem:[#allocation26_spill]] }
  0x19   : > { %p1007_p10 = pneg %p1370_p8 }
  0x1a   : > { %s244_s12 = sshll.u32 %s1948_s3, 4  ;;  %s245_s12 = int_to_ptr.vmem [resolvable:$true] %s244_s12 }
  0x1b   : > { %p1382_p11 = pnand %p1007_p10, %p1938_p1  ;;  %s1087_s21 = scalar_lea.vmem %s245_s12, 64 }
  0x1c   : > { %p1088_p12 = scmp.ne.s32.totalorder %s245_s12, %s1087_s21  ;;  %p1095_p5 = scmp.lt.s32.totalorder %s245_s12, %s245_s12 }
  0x1d   : > { %s233_s16 = sshll.u32 %s1950_s2, 4  ;;  %p1395_p13 = pneg %p1382_p11  ;;  %s1386_s16 = int_to_ptr.vmem [resolvable:$true] %s233_s16 }
  0x1e   : > { %s255_s20 = sshll.u32 %s1952_s4, 4  ;;  %p1096_p7 = scmp.lt.s32.totalorder %s1087_s21, %s1087_s21  ;;  %s1391_s20 = int_to_ptr.vmem [resolvable:$true] %s255_s20 }
  0x1f   : > { %p1090_p0 = pnand %p1395_p13, %p1088_p12 }
  0x20   : > { %p1097_p10 = por %p1096_p7, %p1095_p5 }
  0x21   : > { %p1091_p3 = pneg %p1090_p0 }
  0x23   : > { %p1098_p9 = pnand %p1097_p10, %p1091_p3 }
  0x25   : > { %1101 = shalt.err (!%p1098_p9)
}
  0x26   : > { %s1274_s23 = smov [#allocation10]   ;;  %s1954_s1 = sld [smem:[#allocation23_spill]] }
  0x27   : > { %1016 = dma.vmem_to_smem (!%p1382_p11), %s245_s12, 64, %s1274_s23, [#allocation11]  }
  0x2c   : > { %s1102_s30 = scalar_lea.hbm %s1954_s1, 128 }
  0x2d   : > { %p1103_p1 = scmp.ne.s32.totalorder %s1954_s1, %s1102_s30  ;;  %p1109_p9 = scmp.lt.u32.totalorder %s1102_s30, %s1954_s1 }
  0x2f   : > { %p1105_p12 = pnand %p1103_p1, %p1395_p13 }
  0x31   : > { %p1106_p0 = pneg %p1105_p12 }
  0x33   : > { %p1111_p3 = pnand %p1109_p9, %p1106_p0 }
  0x35   : > { %1114 = shalt.err (!%p1111_p3)
}
  0x36   : > { %s1275_s18 = smov [#allocation8]   ;;  %s1115_s21 = scalar_lea.vmem %s1386_s16, 16 }
  0x37   : > { %1010 = dma.hbm_to_smem (!%p1382_p11), %s1954_s1, 128, %s1275_s18, [#allocation6]  }
  0x38   : > { %p1116_p1 = scmp.ne.s32.totalorder %s1386_s16, %s1115_s21  ;;  %p1123_p10 = scmp.lt.s32.totalorder %s1386_s16, %s1386_s16 }
  0x39   : > { %p1124_p12 = scmp.lt.s32.totalorder %s1115_s21, %s1115_s21 }
  0x3a   : > { %p1118_p5 = pnand %p1116_p1, %p1395_p13 }
  0x3b   : > { %p1125_p0 = por %p1124_p12, %p1123_p10 }
  0x3c   : > { %p1119_p7 = pneg %p1118_p5 }
  0x3e   : > { %p1126_p9 = pnand %p1125_p0, %p1119_p7 }
  0x40   : > { %1129 = shalt.err (!%p1126_p9)
}
  0x41   : > { %s1276_s23 = smov [#allocation9]   ;;  %s1130_s24 = scalar_lea.vmem %s1391_s20, 16 }
  0x42   : > { %1013 = dma.vmem_to_smem (!%p1382_p11), %s1386_s16, 16, %s1276_s23, [#allocation7]  }
  0x43   : > { %p1131_p3 = scmp.ne.s32.totalorder %s1391_s20, %s1130_s24  ;;  %p1138_p2 = scmp.lt.s32.totalorder %s1391_s20, %s1391_s20 }
  0x44   : > { %p1139_p6 = scmp.lt.s32.totalorder %s1130_s24, %s1130_s24 }
  0x45   : > { %p1133_p1 = pnand %p1131_p3, %p1395_p13 }
  0x46   : > { %p1140_p10 = por %p1139_p6, %p1138_p2 }
  0x47   : > { %p1134_p5 = pneg %p1133_p1 }
  0x49   : > { %p1141_p7 = pnand %p1140_p10, %p1134_p5 }
  0x4b   : > { %1144 = shalt.err (!%p1141_p7)
}
  0x4c   : > { %s1277_s25 = smov [#allocation12]   ;;  %s266_s16 = sshll.u32 %s1935_s5, 4  ;;  %s267_s16 = int_to_ptr.vmem [resolvable:$true] %s266_s16 }
  0x4d   : > { %1019 = dma.vmem_to_smem (!%p1382_p11), %s1391_s20, 16, %s1277_s25, [#allocation11]  }
  0x4e   : > { %s1145_s11 = scalar_lea.vmem %s267_s16, 16  ;;  %p1153_p3 = scmp.lt.s32.totalorder %s267_s16, %s267_s16 }
  0x4f   : > { %p1146_p12 = scmp.ne.s32.totalorder %s267_s16, %s1145_s11  ;;  %p1154_p2 = scmp.lt.s32.totalorder %s1145_s11, %s1145_s11 }
  0x51   : > { %p1148_p0 = pnand %p1146_p12, %p1395_p13  ;;  %p1155_p6 = por %p1154_p2, %p1153_p3 }
  0x53   : > { %p1149_p9 = pneg %p1148_p0 }
  0x55   : > { %p1156_p1 = pnand %p1155_p6, %p1149_p9 }
  0x57   : > { %1159 = shalt.err (!%p1156_p1)
}
  0x58   : > { %s1278_s14 = smov [#allocation13]   ;;  %s1445_s20 = sadd.s32 1, %s1272_s29  }
  0x59   : > { %1022 = dma.vmem_to_smem (!%p1382_p11), %s267_s16, 16, %s1278_s14, [#allocation14]  }
  0x5a   : > { %s32_s22 = ssub.s32 %s1272_s29, %s1445_s20  ;;  %s35_s15 = sadd.s32 1, %s1268_s28 }
  0x5b   : > { %p33_p13 = scmp.eq.s32.totalorder %s32_s22, 0  ;;  %p42_p5 = scmp.ne.s32.totalorder %s1268_s28, %s1264_s27 }
  0x5c   : > { %p43_p10 = scmp.eq.s32.totalorder %s1272_s29, 0  ;;  %p1036_p7 = scmp.lt.s32.totalorder %s1272_s29, 2 }
  0x5d   : > { %s1455_s17 = scalar_select %p33_p13, %s1268_s28, %s35_s15  }
  0x5e   : > { %p44_p12 = por %p43_p10, %p42_p5  ;;  %p1955_p0 = scmp.eq.s32.totalorder %s1348_s6, 1 }
  0x5f   : > { %s280_s12 = sand.u32 1, %s1268_s28   ;;  %s882_s19 = sshll.u32 %s1272_s29, 7 }
  0x60   : > { %p1459_p9 = por %p1955_p0, %p42_p5  ;;  %s881_s21 = sshll.u32 %s280_s12, 6 }
  0x61   : > { %s1957_s0 = sld [smem:[#allocation22_spill]]  ;;  %s284_s30 = scalar_lea.vmem [#allocation3], %s881_s21 }
  0x62   : > { %s1956_s18 = scalar_select %p1459_p9, 1, 0 }
  0x63   : > { %s290_s10 = sshll.u32 %s284_s30, 4  ;;  %p1470_p11 = pnand %p1036_p7, %p44_p12  ;;  %s1474_s10 = int_to_ptr.vmem [resolvable:$true] %s290_s10 }
  0x64   : > { %s1476_s11 = scalar_lea.sflag [#allocation4], %s280_s12 }
  0x65   : > { %p1162_p2 = pneg %p1470_p11 }
  0x67   : > { %s1468_s25 = scalar_lea.hbm %s1957_s0, %s882_s19  ;;  %s1165_s19 = scalar_lea.hbm %s1957_s0, 2048 }
  0x68   : > { %s1160_s14 = scalar_lea.hbm %s1468_s25, 1024  ;;  %p1166_p13 = scmp.lt.u32.totalorder %s1468_s25, %s1957_s0 }
  0x69   : > { %p1161_p3 = scmp.ne.s32.totalorder %s1468_s25, %s1160_s14  ;;  %p1167_p5 = scmp.lt.u32.totalorder %s1165_s19, %s1160_s14 }
  0x6a   : > { %p1169_p7 = scmp.lt.u32.totalorder %s1160_s14, %s1468_s25 }
  0x6b   : > { %p1163_p6 = pnand %p1162_p2, %p1161_p3  ;;  %p1168_p10 = por %p1167_p5, %p1166_p13 }
  0x6d   : > { %p1164_p1 = pneg %p1163_p6  ;;  %p1170_p12 = por %p1169_p7, %p1168_p10 }
  0x6f   : > { %p1171_p0 = pnand %p1170_p12, %p1164_p1 }
  0x71   : > { %1174 = shalt.err (!%p1171_p0)
}
  0x72   : > { %s1175_s12 = scalar_lea.vmem %s1474_s10, 1024  ;;  %s1279_s24 = smov [#allocation3]  }
  0x73   : > { %p1176_p3 = scmp.ne.s32.totalorder %s1474_s10, %s1175_s12  ;;  %s1180_s30 = sshll.u32 %s1279_s24, 4  ;;  %s1181_s30 = int_to_ptr.vmem [resolvable:$false] %s1180_s30 }
  0x74   : > { %s1182_s22 = scalar_lea.vmem %s1181_s30, 2048  ;;  %p1183_p4 = scmp.lt.s32.totalorder %s1474_s10, %s1181_s30 }
  0x75   : > { %p1178_p6 = pnand %p1176_p3, %p1162_p2  ;;  %p1184_p13 = scmp.lt.s32.totalorder %s1182_s22, %s1175_s12 }
  0x77   : > { %p1179_p9 = pneg %p1178_p6  ;;  %p1185_p5 = por %p1184_p13, %p1183_p4 }
  0x79   : > { %p1186_p10 = pnand %p1185_p5, %p1179_p9 }
  0x7b   : > { %1189 = shalt.err (!%p1186_p10)
}
  0x7c   : > { %s1280_s14 = smov 256   ;;  %s1281_s15 = smov 128  }
  0x7d   : > { %s1282_s19 = smov 8   ;;  %302 = sbr.rel (%p1370_p8) target bundleno = 275 (0x113), region = 48 }
  0x7e   : > { %1026 = dma.hbm_to_vmem [thread:$0]  (!%p1470_p11), %s1468_s25, 1024, %s1474_s10, %s1476_s11, %s1280_s14, %s1281_s15, %s1282_s19  }
  0x7f   : > { %s1507_s21 = sand.u32 (!%p1370_p8), 1, %s1264_s27   ;;  %p1959_p4 = scmp.ne.s32.totalorder (!%p1370_p8), %s1946_s8, 0 }
  0x80   : > { %s884_s23 = sshll.u32 (!%p1370_p8), %s1507_s21, 6  ;;  %s305_s12 = scalar_lea.sflag (!%p1370_p8), [#allocation4], %s1507_s21 }
  0x81   : > { %s1511_s24 = scalar_lea.vmem (!%p1370_p8), [#allocation3], %s884_s23 }
  0x84   : > { %1235 = dma.done.wait (%p1959_p4), %s305_s12, 1024  }
  0x85   : > { %1237 = vsyncadd (%p1959_p4), %s305_s12, 4294966272  ;;  %p1960_p9 = scmp.eq.s32.totalorder %s1348_s6, 0 }
  0x87   : > { %1239 = dma.done.wait (%p1960_p9), [#allocation6], 128   ;;  %p1961_p8 = pmov %p1960_p9 }
  0x89   : > { %1241 = vsyncadd (%p1961_p8), [#allocation6], 4294967168  ;;  %p1962_p11 = pmov %p1961_p8 }
  0x8a   : > { %p1963_p2 = pmov %p1961_p8 }
  0x8b   : > { %1243 = dma.done.wait (%p1962_p11), [#allocation7], 16  }
  0x8c   : > { %1245 = vsyncadd (%p1963_p2), [#allocation7], 4294967280  ;;  %p1964_p1 = pmov %p1963_p2 }
  0x8e   : > { %1247 = dma.done.wait (%p1964_p1), [#allocation11], 80   ;;  %p1965_p7 = pmov %p1964_p1 }
  0x8f   : > { %p1966_p12 = pmov %p1964_p1 }
  0x90   : > { %1249 = vsyncadd (%p1965_p7), [#allocation11], 4294967216 }
  0x91   : > { %1251 = dma.done.wait (%p1966_p12), [#allocation14], 16   ;;  %p1967_p0 = pmov %p1964_p1 }
  0x93   : > { %1253 = vsyncadd (%p1967_p0), [#allocation14], 4294967280 }
  0x94   : > { %333 = sfence }
  0x95   : > { %s360_s8 = sld [smem:[#allocation8]]  ;;  %s891_s13 = sld [smem:[#allocation8 + $0x1]]  ;;  %v1544_v0 = vld [vmem:[%s1511_s24] sm:$0xff]  ;;  %v1551_v1 = vld [vmem:[%s1511_s24 + $0x8] sm:$0xff]  ;;  %v1558_v2 = vld [vmem:[%s1511_s24 + $0x10] sm:$0xff] }
  0x96   : > { %s892_s25 = sld [smem:[#allocation8 + $0x2]]  ;;  %s1533_s10 = sld [smem:[#allocation8 + $0x3]]  ;;  %v1565_v4 = vld [vmem:[%s1511_s24 + $0x18] sm:$0xff]  ;;  %v1568_v5 = vld [vmem:[%s1511_s24 + $0x20] sm:$0xff]  ;;  %v1576_v8 = vld [vmem:[%s1511_s24 + $0x28] sm:$0xff] }
  0x97   : > { %s1535_s16 = sld [smem:[#allocation8 + $0x4]]  ;;  %s1537_s11 = sld [smem:[#allocation8 + $0x5]]  ;;  %v1579_v9 = vld [vmem:[%s1511_s24 + $0x30] sm:$0xff]  ;;  %v1606_v24 = vld [vmem:[%s1511_s24 + $0x38] sm:$0xff] }
  0x98   : > { %s1539_s30 = sld [smem:[#allocation8 + $0x6]]  ;;  %s1541_s22 = sld [smem:[#allocation8 + $0x7]] }
  0x99   : > { %s1546_s14 = sld [smem:[#allocation8 + $0x80]]  ;;  %s1548_s15 = sld [smem:[#allocation8 + $0x81]] }
  0x9a   : > { %s1553_s19 = sld [smem:[#allocation8 + $0x82]]  ;;  %s1555_s23 = sld [smem:[#allocation8 + $0x83]] }
  0x9b   : > { %v469_v3 = vstv %s360_s8  ;;  %s1560_s12 = sld [smem:[#allocation8 + $0x84]]  ;;  %s1562_s0 = sld [smem:[#allocation8 + $0x85]]  ;;  %v471_v7 = vstv %s891_s13 }
  0x9c   : > { %v470_v6 = vmul.f32 %v469_v3, %v1544_v0  ;;  %s1571_s1 = sld [smem:[#allocation8 + $0x86]]  ;;  %s1573_s2 = sld [smem:[#allocation8 + $0x87]]  ;;  %v472_v10 = vmul.f32 %v1551_v1, %v471_v7  ;;  %v474_v11 = vstv %s892_s25  ;;  %v477_v12 = vstv %s1533_s10 }
  0x9d   : > { %s1583_s8 = sld [smem:[#allocation8 + $0x100]]  ;;  %s1585_s3 = sld [smem:[#allocation8 + $0x101]]  ;;  %v475_v13 = vmul.f32 %v1558_v2, %v474_v11  ;;  %v480_v14 = vstv %s1535_s16  ;;  %v483_v15 = vstv %s1537_s11  ;;  %v478_v17 = vmul.f32 %v1565_v4, %v477_v12 }
  0x9e   : > { %s1590_s13 = sld [smem:[#allocation8 + $0x102]]  ;;  %s1592_s4 = sld [smem:[#allocation8 + $0x103]]  ;;  %v473_v16 = vadd.f32 %v472_v10, %v470_v6  ;;  %v481_v18 = vmul.f32 %v1568_v5, %v480_v14  ;;  %v486_v19 = vstv %s1539_s30  ;;  %v484_v20 = vmul.f32 %v1576_v8, %v483_v15 }
  0x9f   : > { %s1597_s25 = sld [smem:[#allocation8 + $0x104]]  ;;  %s1599_s10 = sld [smem:[#allocation8 + $0x105]]  ;;  %v487_v21 = vmul.f32 %v1579_v9, %v486_v19  ;;  %v495_v22 = vstv %s1546_s14  ;;  %v497_v23 = vstv %s1548_s15  ;;  %v489_v26 = vstv %s1541_s22 }
  0xa0   : > { %v476_v25 = vadd.f32 %v475_v13, %v473_v16  ;;  %v496_v27 = vmul.f32 %v495_v22, %v1544_v0  ;;  %v498_v28 = vmul.f32 %v1551_v1, %v497_v23  ;;  %s1611_s16 = sld [smem:[#allocation8 + $0x106]]  ;;  %s1613_s11 = sld [smem:[#allocation8 + $0x180]]  ;;  %v500_v29 = vstv %s1553_s19 }
  0xa1   : > { %v503_v30 = vstv %s1555_s23  ;;  %v506_v31 = vstv %s1560_s12  ;;  %v509_v32 = vstv %s1562_s0  ;;  %s1619_s30 = sld [smem:[#allocation8 + $0x107]]  ;;  %v501_v35 = vmul.f32 %v1558_v2, %v500_v29  ;;  %s1623_s24 = sld [smem:[#allocation8 + $0x181]] }
  0xa2   : > { %v479_v33 = vadd.f32 %v478_v17, %v476_v25  ;;  %v499_v34 = vadd.f32 %v498_v28, %v496_v27  ;;  %v504_v36 = vmul.f32 %v1565_v4, %v503_v30  ;;  %s1625_s22 = sld [smem:[#allocation8 + $0x182]]  ;;  %v490_v37 = vmul.f32 %v1606_v24, %v489_v26  ;;  %s1631_s0 = sld [smem:[#allocation8 + $0x183]] }
  0xa3   : > { %v507_v38 = vmul.f32 %v1568_v5, %v506_v31  ;;  %v510_v39 = vmul.f32 %v1576_v8, %v509_v32  ;;  %v512_v40 = vstv %s1571_s1  ;;  %s1633_s14 = sld [smem:[#allocation8 + $0x184]]  ;;  %v515_v44 = vstv %s1573_s2  ;;  %s1637_s15 = sld [smem:[#allocation8 + $0x185]] }
  0xa4   : > { %v482_v41 = vadd.f32 %v481_v18, %v479_v33  ;;  %v502_v42 = vadd.f32 %v501_v35, %v499_v34  ;;  %v513_v43 = vmul.f32 %v1579_v9, %v512_v40  ;;  %s1639_s19 = sld [smem:[#allocation8 + $0x186]]  ;;  %v521_v45 = vstv %s1583_s8  ;;  %s1647_s1 = sld [smem:[#allocation8 + $0x187]] }
  0xa5   : > { %v523_v46 = vstv %s1585_s3  ;;  %v526_v47 = vstv %s1590_s13  ;;  %v529_v48 = vstv %s1592_s4  ;;  %v522_v51 = vmul.f32 %v521_v45, %v1544_v0  ;;  %s1653_s2 = sld [smem:[#allocation8 + $0x200]]  ;;  %s1656_s3 = sld [smem:[#allocation8 + $0x201]] }
  0xa6   : > { %v485_v49 = vadd.f32 %v484_v20, %v482_v41  ;;  %v505_v50 = vadd.f32 %v504_v36, %v502_v42  ;;  %v524_v52 = vmul.f32 %v1551_v1, %v523_v46  ;;  %v516_v53 = vmul.f32 %v1606_v24, %v515_v44  ;;  %s1658_s4 = sld [smem:[#allocation8 + $0x202]]  ;;  %s1664_s23 = sld [smem:[#allocation8 + $0x203]] }
  0xa7   : > { %v527_v54 = vmul.f32 %v1558_v2, %v526_v47  ;;  %v532_v55 = vstv %s1597_s25  ;;  %v535_v56 = vstv %s1599_s10  ;;  %v530_v60 = vmul.f32 %v1565_v4, %v529_v48  ;;  %s1667_s12 = sld [smem:[#allocation8 + $0x204]]  ;;  %s1673_s8 = sld [smem:[#allocation8 + $0x205]] }
  0xa8   : > { %v488_v57 = vadd.f32 %v487_v21, %v485_v49  ;;  %v508_v58 = vadd.f32 %v507_v38, %v505_v50  ;;  %v525_v59 = vadd.f32 %v524_v52, %v522_v51  ;;  %v533_v61 = vmul.f32 %v1568_v5, %v532_v55  ;;  %s1677_s13 = sld [smem:[#allocation9]]  ;;  %s1679_s25 = sld [smem:[#allocation9 + $0x1]] }
  0xa9   : > { %v536_v62 = vmul.f32 %v1576_v8, %v535_v56  ;;  %v538_v63 = vstv %s1611_s16  ;;  %v547_v3 = vstv %s1613_s11  ;;  %v541_v11 = vstv %s1619_s30  ;;  %s1685_s10 = sld [smem:[#allocation9 + $0x2]]  ;;  %s1687_s16 = sld [smem:[#allocation9 + $0x3]] }
  0xaa   : > { %v491_v6 = vadd.f32 %v490_v37, %v488_v57  ;;  %v511_v7 = vadd.f32 %v510_v39, %v508_v58  ;;  %v528_v10 = vadd.f32 %v527_v54, %v525_v59  ;;  %v539_v12 = vmul.f32 %v1579_v9, %v538_v63  ;;  %s1691_s11 = sld [smem:[#allocation8 + $0x206]]  ;;  %s1696_s30 = sld [smem:[#allocation8 + $0x207]] }
  0xab   : > { %v548_v13 = vmul.f32 %v547_v3, %v1544_v0  ;;  %v549_v14 = vstv %s1623_s24  ;;  %v552_v15 = vstv %s1625_s22  ;;  %v555_v20 = vstv %s1631_s0  ;;  %s1698_s24 = sld [smem:[#allocation8 + $0x280]]  ;;  %s1702_s22 = sld [smem:[#allocation8 + $0x281]] }
  0xac   : > { %v514_v16 = vadd.f32 %v513_v43, %v511_v7  ;;  %v531_v17 = vadd.f32 %v530_v60, %v528_v10  ;;  %v550_v18 = vmul.f32 %v1551_v1, %v549_v14  ;;  %v553_v19 = vmul.f32 %v1558_v2, %v552_v15  ;;  %s1704_s0 = sld [smem:[#allocation9 + $0x4]]  ;;  %p1968_p6 = scmp.ne.s32.totalorder %s1956_s18, 0 }
  0xad   : > { %v558_v21 = vstv %s1633_s14  ;;  %v561_v22 = vstv %s1637_s15  ;;  %v564_v23 = vstv %s1639_s19  ;;  %v542_v26 = vmul.f32 %v1606_v24, %v541_v11  ;;  %s1710_s14 = sld [smem:[#allocation8 + $0x282]]  ;;  %s1712_s15 = sld [smem:[#allocation8 + $0x283]] }
  0xae   : > { %v534_v25 = vadd.f32 %v533_v61, %v531_v17  ;;  %v551_v27 = vadd.f32 %v550_v18, %v548_v13  ;;  %v556_v28 = vmul.f32 %v1565_v4, %v555_v20  ;;  %v517_v29 = vadd.f32 %v516_v53, %v514_v16  ;;  %s1716_s19 = sld [smem:[#allocation8 + $0x284]] }
  0xaf   : > { %v559_v30 = vmul.f32 %v1568_v5, %v558_v21  ;;  %v562_v31 = vmul.f32 %v1576_v8, %v561_v22  ;;  %v567_v32 = vstv %s1647_s1  ;;  %v565_v35 = vmul.f32 %v1579_v9, %v564_v23  ;;  %s1722_s1 = sld [smem:[#allocation8 + $0x285]] }
  0xb0   : > { %v537_v33 = vadd.f32 %v536_v62, %v534_v25  ;;  %v554_v34 = vadd.f32 %v553_v19, %v551_v27  ;;  %v573_v36 = vstv %s1653_s2  ;;  %v568_v37 = vmul.f32 %v1606_v24, %v567_v32  ;;  %s1724_s2 = sld [smem:[#allocation8 + $0x286]] }
  0xb1   : > { %v574_v38 = vmul.f32 %v573_v36, %v1544_v0  ;;  %v575_v39 = vstv %s1656_s3  ;;  %v578_v40 = vstv %s1658_s4  ;;  %v581_v44 = vstv %s1664_s23  ;;  %s1729_s3 = sld [smem:[#allocation8 + $0x287]]  ;;  %s1731_s4 = sld [smem:[#allocation9 + $0x5]] }
  0xb2   : > { %v540_v41 = vadd.f32 %v539_v12, %v537_v33  ;;  %v557_v42 = vadd.f32 %v556_v28, %v554_v34  ;;  %v576_v43 = vmul.f32 %v1551_v1, %v575_v39  ;;  %v492_v45 = vstv %s1677_s13  ;;  %s1737_s23 = sld [smem:[#allocation10]]  ;;  %s1744_s13 = sld [smem:[#allocation10 + $0x2]] }
  0xb3   : > { %v518_v46 = vstv %s1679_s25  ;;  %v579_v47 = vmul.f32 %v1558_v2, %v578_v40  ;;  %v584_v48 = vstv %s1667_s12  ;;  %v493_v49 = vadd.f32 %v492_v45, %v491_v6  ;;  %s1739_s12 = sld [smem:[#allocation10 + $0x1]]  ;;  %s1746_s25 = sld [smem:[#allocation10 + $0x3]] }
  0xb4   : > { %v519_v50 = vadd.f32 %v518_v46, %v517_v29  ;;  %v543_v51 = vadd.f32 %v542_v26, %v540_v41  ;;  %v544_v52 = vstv %s1685_s10  ;;  %v560_v53 = vadd.f32 %v559_v30, %v557_v42  ;;  %s1757_s10 = sld [smem:[#allocation10 + $0x5]] }
  0xb5   : > { %v570_v54 = vstv %s1687_s16  ;;  %v577_v55 = vadd.f32 %v576_v43, %v574_v38  ;;  %v582_v56 = vmul.f32 %v1565_v4, %v581_v44  ;;  %v1733_v57 = vmax.f32 %v493_v49, 0.0  ;;  %s1763_s16 = sld [smem:[#allocation10 + $0x80]] }
  0xb6   : > { %v545_v58 = vadd.f32 %v544_v52, %v543_v51  ;;  %v585_v59 = vmul.f32 %v1568_v5, %v584_v48  ;;  %v587_v60 = vstv %s1673_s8  ;;  %v1741_v61 = vmax.f32 %v519_v50, 0.0  ;;  %s1755_s8 = sld [smem:[#allocation10 + $0x4]] }
  0xb7   : > { %v563_v62 = vadd.f32 %v562_v31, %v560_v53  ;;  %v580_v63 = vadd.f32 %v579_v47, %v577_v55  ;;  %v590_v3 = vstv %s1691_s11  ;;  %v588_v7 = vmul.f32 %v1576_v8, %v587_v60  ;;  %s1765_s11 = sld [smem:[#allocation10 + $0x81]] }
  0xb8   : > { %v1748_v6 = vmax.f32 %v545_v58, 0.0  ;;  %v591_v10 = vmul.f32 %v1579_v9, %v590_v3  ;;  %v593_v11 = vstv %s1696_s30  ;;  %v596_v14 = vstv %s1704_s0  ;;  %s1769_s30 = sld [smem:[#allocation10 + $0x82]]  ;;  %s1780_s0 = sld [smem:[#allocation12]] }
  0xb9   : > { %v566_v12 = vadd.f32 %v565_v35, %v563_v62  ;;  %v583_v13 = vadd.f32 %v582_v56, %v580_v63  ;;  %v599_v15 = vstv %s1698_s24  ;;  %v601_v17 = vstv %s1702_s22  ;;  %s1771_s24 = sld [smem:[#allocation10 + $0x83]]  ;;  %s1778_s22 = sld [smem:[#allocation10 + $0x84]] }
  0xba   : > { %v600_v16 = vmul.f32 %v599_v15, %v1544_v0  ;;  %v604_v18 = vstv %s1710_s14  ;;  %v607_v19 = vstv %s1712_s15  ;;  %v602_v22 = vmul.f32 %v1551_v1, %v601_v17  ;;  %s1789_s14 = sld [smem:[#allocation10 + $0x85]]  ;;  %s1791_s15 = sld [smem:[#allocation10 + $0x100]] }
  0xbb   : > { %v569_v20 = vadd.f32 %v568_v37, %v566_v12  ;;  %v586_v21 = vadd.f32 %v585_v59, %v583_v13  ;;  %v605_v23 = vmul.f32 %v1558_v2, %v604_v18  ;;  %v594_v0 = vmul.f32 %v1606_v24, %v593_v11 }
  0xbc   : > { %v610_v25 = vstv %s1716_s19  ;;  %v613_v26 = vstv %s1722_s1  ;;  %v616_v27 = vstv %s1724_s2  ;;  %v603_v30 = vadd.f32 %v602_v22, %v600_v16  ;;  %s1797_s19 = sld [smem:[#allocation10 + $0x101]]  ;;  %s1803_s2 = sld [smem:[#allocation10 + $0x102]] }
  0xbd   : > { %v571_v28 = vadd.f32 %v570_v54, %v569_v20  ;;  %v589_v29 = vadd.f32 %v588_v7, %v586_v21  ;;  %v608_v1 = vmul.f32 %v1565_v4, %v607_v19  ;;  %v611_v2 = vmul.f32 %v1568_v5, %v610_v25  ;;  %s1799_s1 = sld [smem:[#allocation12 + $0x1]] }
  0xbe   : > { %v614_v31 = vmul.f32 %v1576_v8, %v613_v26  ;;  %v617_v32 = vmul.f32 %v1579_v9, %v616_v27  ;;  %v619_v33 = vstv %s1729_s3  ;;  %v606_v36 = vadd.f32 %v605_v23, %v603_v30  ;;  %s1805_s3 = sld [smem:[#allocation10 + $0x103]] }
  0xbf   : > { %v1786_v34 = vmax.f32 %v571_v28, 0.0  ;;  %v592_v35 = vadd.f32 %v591_v10, %v589_v29  ;;  %v622_v37 = vstv %s1731_s4  ;;  %v625_v4 = vstv %s1737_s23  ;;  %s1811_s4 = sld [smem:[#allocation10 + $0x104]]  ;;  %s1814_s23 = sld [smem:[#allocation10 + $0x105]] }
  0xc0   : > { %v627_v38 = vstv %s1739_s12  ;;  %v630_v39 = vstv %s1744_s13  ;;  %v633_v40 = vstv %s1746_s25  ;;  %v609_v8 = vadd.f32 %v608_v1, %v606_v36  ;;  %s1820_s12 = sld [smem:[#allocation10 + $0x180]]  ;;  %s1822_s13 = sld [smem:[#allocation10 + $0x181]] }
  0xc1   : > { %v595_v5 = vadd.f32 %v594_v0, %v592_v35  ;;  %v626_v9 = vmul.f32 %v625_v4, %v1733_v57  ;;  %v628_v41 = vmul.f32 %v627_v38, %v1741_v61  ;;  %v620_v42 = vmul.f32 %v1606_v24, %v619_v33  ;;  %s1831_s25 = sld [smem:[#allocation10 + $0x182]] }
  0xc2   : > { %v631_v43 = vmul.f32 %v630_v39, %v1748_v6  ;;  %v634_v44 = vmul.f32 %v633_v40, %v1786_v34  ;;  %v636_v45 = vstv %s1755_s8  ;;  %v612_v47 = vadd.f32 %v611_v2, %v609_v8  ;;  %s1835_s8 = sld [smem:[#allocation10 + $0x183]] }
  0xc3   : > { %v597_v46 = vadd.f32 %v596_v14, %v595_v5  ;;  %v629_v48 = vadd.f32 %v628_v41, %v626_v9  ;;  %v639_v49 = vstv %s1757_s10  ;;  %v645_v50 = vstv %s1763_s16  ;;  %s1840_s10 = sld [smem:[#allocation10 + $0x184]]  ;;  %s1845_s16 = sld [smem:[#allocation10 + $0x185]] }
  0xc4   : > { %v647_v51 = vstv %s1765_s11  ;;  %v650_v52 = vstv %s1769_s30  ;;  %v653_v53 = vstv %s1771_s24  ;;  %v615_v54 = vadd.f32 %v614_v31, %v612_v47  ;;  %s1850_s11 = sld [smem:[#allocation12 + $0x2]]  ;;  %s1854_s30 = sld [smem:[#allocation13]] }
  0xc5   : > { %v1824_v24 = vmax.f32 %v597_v46, 0.0  ;;  %v632_v55 = vadd.f32 %v631_v43, %v629_v48  ;;  %v646_v56 = vmul.f32 %v645_v50, %v1733_v57  ;;  %v642_v58 = vstv %s1780_s0  ;;  %s1856_s24 = sld [smem:[#allocation13 + $0x1]]  ;;  %s1867_s0 = sld [smem:[#allocation13 + $0x2]] }
  0xc6   : > { %v648_v59 = vmul.f32 %v647_v51, %v1741_v61  ;;  %v651_v60 = vmul.f32 %v650_v52, %v1748_v6  ;;  %v656_v62 = vstv %s1778_s22  ;;  %v618_v63 = vadd.f32 %v617_v32, %v615_v54  ;;  %s1865_s22 = sld [smem:[#allocation12 + $0x3]] }
  0xc7   : > { %v635_v3 = vadd.f32 %v634_v44, %v632_v55  ;;  %v637_v7 = vmul.f32 %v636_v45, %v1824_v24  ;;  %v654_v10 = vmul.f32 %v653_v53, %v1786_v34  ;;  %v657_v12 = vmul.f32 %v656_v62, %v1824_v24 }
  0xc8   : > { %v649_v11 = vadd.f32 %v648_v59, %v646_v56  ;;  %v659_v13 = vstv %s1789_s14  ;;  %v665_v14 = vstv %s1791_s15  ;;  %v621_v15 = vadd.f32 %v620_v42, %v618_v63  ;;  %s971_s14 = sld [smem:[#allocation13 + $0x3]] }
  0xc9   : > { %v662_v16 = vstv %s1799_s1  ;;  %v666_v17 = vmul.f32 %v665_v14, %v1733_v57  ;;  %v667_v18 = vstv %s1797_s19  ;;  %v670_v21 = vstv %s1803_s2  ;;  %s446_s15 = sld [smem:[#allocation2]]  ;;  %s890_s19 = sshll.u32 %s1507_s21, 3 }
  0xca   : > { %v652_v19 = vadd.f32 %v651_v60, %v649_v11  ;;  %v668_v20 = vmul.f32 %v667_v18, %v1741_v61  ;;  %v673_v22 = vstv %s1805_s3  ;;  %v623_v23 = vadd.f32 %v622_v37, %v621_v15  ;;  %s980_s1 = sshll.u32 %s1348_s6, 7  ;;  %s359_s2 = scalar_lea.vmem [#allocation15], %s890_s19 }
  0xcb   : > { %v638_v0 = vadd.f32 %v637_v7, %v635_v3  ;;  %v671_v25 = vmul.f32 %v670_v21, %v1748_v6  ;;  %v676_v26 = vstv %s1811_s4  ;;  %v674_v29 = vmul.f32 %v673_v22, %v1786_v34  ;;  %s743_s3 = sshll.u32 %s359_s2, 4  ;;  %s1283_s6 = smov [#allocation15]   ;;  %s1888_s3 = int_to_ptr.vmem [resolvable:$true] %s743_s3 }
  0xcc   : > { %v655_v27 = vadd.f32 %v654_v10, %v652_v19  ;;  %v669_v28 = vadd.f32 %v668_v20, %v666_v17  ;;  %v679_v30 = vstv %s1814_s23  ;;  %v624_v1 = vmax.f32 %v623_v23, 0.0 }
  0xcd   : > { %v677_v2 = vmul.f32 %v676_v26, %v1824_v24  ;;  %v685_v31 = vstv %s1820_s12  ;;  %v687_v32 = vstv %s1822_s13  ;;  %v690_v40 = vstv %s1831_s25  ;;  %s1886_s12 = scalar_lea.hbm %s1937_s7, %s980_s1  ;;  %s730_s13 = scalar_lea.sflag [#allocation5], %s1507_s21 }
  0xce   : > { %v658_v33 = vadd.f32 %v657_v12, %v655_v27  ;;  %v672_v35 = vadd.f32 %v671_v25, %v669_v28  ;;  %v686_v36 = vmul.f32 %v685_v31, %v1733_v57  ;;  %v688_v37 = vmul.f32 %v687_v32, %v1741_v61  ;;  %s1190_s25 = scalar_lea.vmem %s1888_s3, 128 }
  0xcf   : > { %v640_v4 = vmul.f32 %v639_v49, %v624_v1  ;;  %v660_v38 = vmul.f32 %v659_v13, %v624_v1  ;;  %v680_v39 = vmul.f32 %v679_v30, %v624_v1  ;;  %v691_v9 = vmul.f32 %v690_v40, %v1748_v6  ;;  %p1191_p3 = scmp.ne.s32.totalorder %s1888_s3, %s1190_s25 }
  0xd0   : > { %v675_v5 = vadd.f32 %v674_v29, %v672_v35  ;;  %v689_v8 = vadd.f32 %v688_v37, %v686_v36  ;;  %v693_v41 = vstv %s1835_s8  ;;  %v696_v43 = vstv %s1840_s10  ;;  %s1194_s8 = sshll.u32 %s1283_s6, 4  ;;  %s1195_s8 = int_to_ptr.vmem [resolvable:$false] %s1194_s8 }
  0xd1   : > { %v641_v42 = vadd.f32 %v640_v4, %v638_v0  ;;  %v661_v57 = vadd.f32 %v660_v38, %v658_v33  ;;  %v694_v61 = vmul.f32 %v693_v41, %v1786_v34  ;;  %v697_v46 = vmul.f32 %v696_v43, %v1824_v24  ;;  %p1192_p13 = pnand %p1191_p3, %p1968_p6  ;;  %s1196_s10 = scalar_lea.vmem %s1195_s8, 256 }
  0xd2   : > { %v678_v44 = vadd.f32 %v677_v2, %v675_v5  ;;  %v692_v45 = vadd.f32 %v691_v9, %v689_v8  ;;  %v699_v47 = vstv %s1845_s16  ;;  %v682_v50 = vstv %s1850_s11  ;;  %p1197_p10 = scmp.lt.s32.totalorder %s1888_s3, %s1195_s8  ;;  %p1198_p4 = scmp.lt.s32.totalorder %s1196_s10, %s1190_s25 }
  0xd3   : > { %v643_v48 = vadd.f32 %v642_v58, %v641_v42  ;;  %v663_v49 = vadd.f32 %v662_v16, %v661_v57  ;;  %v700_v6 = vmul.f32 %v699_v47, %v624_v1  ;;  %v705_v53 = vstv %s1854_s30  ;;  %p1193_p5 = pneg %p1192_p13 }
  0xd4   : > { %v681_v51 = vadd.f32 %v680_v39, %v678_v44  ;;  %v695_v52 = vadd.f32 %v694_v61, %v692_v45  ;;  %v707_v54 = vstv %s1856_s24  ;;  %v702_v60 = vstv %s1865_s22  ;;  %p1199_p9 = por %p1198_p4, %p1197_p10 }
  0xd5   : > { %v644_v55 = vmax.f32 %v643_v48, 0.0  ;;  %v664_v56 = vmax.f32 %v663_v49, 0.0  ;;  %v710_v63 = vstv %s1867_s0  ;;  %v713_v12 = vstv %s971_s14 }
  0xd6   : > { %v683_v34 = vadd.f32 %v682_v50, %v681_v51  ;;  %v698_v59 = vadd.f32 %v697_v46, %v695_v52  ;;  %v716_v16 = vstv %s446_s15  ;;  %p1200_p8 = pnand %p1199_p9, %p1193_p5 }
  0xd7   : > { %v706_v62 = vmul.f32 %v705_v53, %v644_v55  ;;  %v708_v24 = vmul.f32 %v707_v54, %v664_v56 }
  0xd8   : > { %v684_v3 = vmax.f32 %v683_v34, 0.0  ;;  %v701_v7 = vadd.f32 %v700_v6, %v698_v59 }
  0xd9   : > { %v709_v58 = vadd.f32 %v708_v24, %v706_v62 }
  0xda   : > { %v703_v10 = vadd.f32 %v702_v60, %v701_v7  ;;  %v711_v11 = vmul.f32 %v710_v63, %v684_v3 }
  0xdc   : > { %v704_v13 = vmax.f32 %v703_v10, 0.0  ;;  %v712_v14 = vadd.f32 %v711_v11, %v709_v58 }
  0xde   : > { %v714_v15 = vmul.f32 %v713_v12, %v704_v13 }
  0xe0   : > { %v715_v17 = vadd.f32 %v714_v15, %v712_v14 }
  0xe2   : > { %v717_v18 = vadd.f32 %v716_v16, %v715_v17 }
  0xe4   : > { %v718_v19 = vand.u32 2147483647, %v717_v18  ;;  %vm725_vm0 = vcmp.ge.f32.partialorder %v717_v18, 0.0 }
  0xe6   : > { %v719_v20 = vsub.f32 0.0, %v718_v19 }
  0xe8   : > { %v720_v21 = vmul.f32 1.442695, %v719_v20 }
  0xea   : > { %1083 = vpow2.f32 %v720_v21 }
  0xf4   : > { %v1084_v22 = vpop.eup %1083 }
  0xf5   : > { %v722_v23 = vadd.f32 1.0, %v1084_v22 }
  0xf7   : > { %1085 = vrcp.f32 %v722_v23 }
 0x101   : > { %v1086_v0 = vpop.eup %1085 }
 0x102   : > { %v726_v25 = vmul.f32 %v1086_v0, %v1084_v22 }
 0x104   : > { %v727_v26 = vsel %vm725_vm0, %v1086_v0, %v726_v25 }
 0x105   : > { %728 = vst [vmem:[%s359_s2] sm:$0xff] %v727_v26 }
 0x106   : > { %1203 = shalt.err (!%p1200_p8)
}
 0x107   : > { %s1204_s21 = scalar_lea.hbm %s1886_s12, 128  ;;  %s1208_s30 = scalar_lea.hbm %s1937_s7, 256 }
 0x108   : > { %p1205_p11 = scmp.ne.s32.totalorder %s1886_s12, %s1204_s21  ;;  %p1209_p7 = scmp.lt.u32.totalorder %s1886_s12, %s1937_s7 }
 0x109   : > { %p1210_p12 = scmp.lt.u32.totalorder %s1208_s30, %s1204_s21  ;;  %p1212_p3 = scmp.lt.u32.totalorder %s1204_s21, %s1886_s12 }
 0x10a   : > { %p1206_p2 = pnand %p1205_p11, %p1968_p6 }
 0x10b   : > { %p1211_p0 = por %p1210_p12, %p1209_p7 }
 0x10c   : > { %p1207_p1 = pneg %p1206_p2 }
 0x10d   : > { %p1213_p13 = por %p1212_p3, %p1211_p0 }
 0x10f   : > { %p1214_p5 = pnand %p1213_p13, %p1207_p1 }
 0x111   : > { %1217 = shalt.err (!%p1214_p5)
}
 0x112   : > { %1005 = dma.vmem_to_hbm [thread:$0]  (%p1968_p6), %s1888_s3, 128, %s1886_s12, %s730_s13  }
 0x113 PF: > { %s755_s0 = sand.u32 1, %s1260_s26   ;;  %p1969_p10 = scmp.ne.s32.totalorder %s1947_s9, 0 }
 0x114   : > { %p1970_p4 = scmp.ge.s32.totalorder %s1272_s29, 2  ;;  %s756_s14 = scalar_lea.sflag [#allocation5], %s755_s0 }
 0x116   : > { %p1028_p9 = pnand %p1970_p4, %p1969_p10 }
 0x118   : > { %1255 = dma.done.wait (!%p1028_p9), %s756_s14, 128  }
 0x119   : > { %1257 = vsyncadd (!%p1028_p9), %s756_s14, 4294967168  ;;  %p25_p8 = scmp.ge.s32.totalorder %s1445_s20, 4   ;;  %s1971_s26 = smov %s1264_s27 }
 0x11a   : > { %s1972_s27 = smov %s1268_s28  ;;  %s1973_s28 = smov %s1455_s17 }
 0x11b   : > { %s1974_s29 = smov %s1445_s20  ;;  %27 = sbr.rel (!%p25_p8) target bundleno = 16 (0x10), region = 122 }
 0x122   :  { %761 = vsyncpa [#allocation4], 1 }
 0x123   :  { %763 = vsyncpa [#allocation4 + $0x1], 1 }
 0x124   :  { %764 = vsyncpa [#allocation5], 1 }
 0x125   :  { %766 = vsyncpa [#allocation5 + $0x1], 1 }
 0x126   :  { %767 = vsyncpa [#allocation6], 1 }
 0x127   :  { %769 = vsyncpa [#allocation6 + $0x1], 1 }
 0x128   :  { %770 = vsyncpa [#allocation7], 1 }
 0x129   :  { %772 = vsyncpa [#allocation7 + $0x1], 1 }
 0x12a   :  { %773 = vsyncpa [#allocation11], 1 }
 0x12b   :  { %774 = vsyncpa [#allocation14], 1 }

</bundles_post_ra>
